<compile_context>
chip_gen: v7x
topology: tpu7x:2x2x1
jax: 0.10.0
libtpu: 0.0.40
codegen_flags: <defaults>
</compile_context>

<pallas_src>
import jax
import jax.numpy as jnp
from jax import lax
from jax.experimental import pallas as pl
from jax.experimental.pallas import tpu as pltpu


# ------------------------------------------------------------------- kernel --

def _attention_gate_kernel(xc_ref, gu_ref, wth_ref, wphi_ref, bphi_ref,
                           wpsi_ref, bpsi_ref, ww_ref, bw_ref, out_ref):
    """Fused gate + output for one half-resolution row tile.

    xc_ref : (tm, 4*C) bf16 -- x at the four 2x2 patch offsets, channel block
                               t = 2*a + b holds x[..., 2*ht+a, 2*wt+b, :].
    gu_ref : (tm, C)   bf16 -- nearest-upsampled g.
    wth_ref: (4*C, C)  bf16 -- the four theta taps stacked along K (t = 2*a+b).
    out_ref: (tm, 4*C) bf16 -- result rows; channel block t = output pixel
                               (2*ht+a, 2*wt+b).
    """
    tm = xc_ref.shape[0]
    c = wphi_ref.shape[0]

    # theta(x): single K=4*C MXU accumulation chain; + phi(g_up): one more dot.
    acc = jnp.dot(xc_ref[...], wth_ref[...], preferred_element_type=jnp.float32)
    acc += jnp.dot(gu_ref[...], wphi_ref[...], preferred_element_type=jnp.float32)
    f = jnp.maximum(acc + bphi_ref[...], 0.0)                 # f32 ReLU

    psi = jnp.dot(f.astype(jnp.bfloat16), wpsi_ref[...],
                  preferred_element_type=jnp.float32) + bpsi_ref[...]
    s = jax.nn.sigmoid(psi)                                   # (tm, C) gate, f32

    # Hoisted bias broadcast (JAX does not CSE broadcast_in_dim).
    bw = jnp.broadcast_to(bw_ref[...], (tm, c))

    # result = W(s * x) + x for each of the four full-res pixels of the patch.
    for t in range(4):
        xt = xc_ref[:, t * c:(t + 1) * c]                     # bf16 lane slice
        xt_f32 = xt.astype(jnp.float32)
        y = (s * xt_f32).astype(jnp.bfloat16)
        wy = jnp.dot(y, ww_ref[...], preferred_element_type=jnp.float32)
        out_ref[:, t * c:(t + 1) * c] = (wy + bw + xt_f32).astype(out_ref.dtype)


# ------------------------------------------------------------------ tiling ---

def _choose_rows(n_rows, target=512, min_tiles=2):
    """Row tile (multiple of 16, <= target) and padded row count (multiple of it).

    Tries to expose at least `min_tiles` grid steps so the 'parallel' grid axis
    can be sharded across both TensorCores on v7x (no-op on v5e/v6e).
    """
    n16 = -(-n_rows // 16) * 16
    tm = min(target, n16)
    if n16 // tm < min_tiles and n16 >= min_tiles * 16:
        tm = max(16, (n16 // min_tiles // 16) * 16)
    n_pad = -(-n16 // tm) * tm
    return tm, n_pad


def _fused_gate_pallas(xcat, gup, wth, wphi, bphi, wpsi, bpsi, ww, bw, tm, c):
    n_rows = xcat.shape[0]
    grid = (n_rows // tm,)
    return pl.pallas_call(
        _attention_gate_kernel,
        out_shape=jax.ShapeDtypeStruct((n_rows, 4 * c), jnp.bfloat16),
        grid_spec=pltpu.PrefetchScalarGridSpec(
            num_scalar_prefetch=0,
            grid=grid,
            in_specs=[
                pl.BlockSpec((tm, 4 * c), lambda i: (i, 0)),   # x, 2x2 patchified
                pl.BlockSpec((tm, c), lambda i: (i, 0)),       # g_up
                pl.BlockSpec((4 * c, c), lambda i: (0, 0)),    # theta taps (K=4C)
                pl.BlockSpec((c, c), lambda i: (0, 0)),        # phi weight
                pl.BlockSpec((1, c), lambda i: (0, 0)),        # phi bias
                pl.BlockSpec((c, c), lambda i: (0, 0)),        # psi weight
                pl.BlockSpec((1, c), lambda i: (0, 0)),        # psi bias
                pl.BlockSpec((c, c), lambda i: (0, 0)),        # W weight
                pl.BlockSpec((1, c), lambda i: (0, 0)),        # W bias
            ],
            out_specs=pl.BlockSpec((tm, 4 * c), lambda i: (i, 0)),
        ),
        compiler_params=pltpu.CompilerParams(
            dimension_semantics=("parallel",),
            vmem_limit_bytes=32 * 1024 * 1024,
        ),
    )(xcat, gup, wth, wphi, bphi, wpsi, bpsi, ww, bw)


# --------------------------------------------------------------- full module --

@jax.jit
def attention_gate(x, g, params):
    """Forward of AttentionGate('concatenation', dimension=2). x, g are NCHW f32."""
    B, C, H, W = x.shape
    Bg, Cg, Hg, Wg = g.shape
    assert B == Bg and C == Cg
    assert H % 2 == 0 and W % 2 == 0, "theta (k=2, s=2) assumes even spatial dims"
    Ht, Wt = H // 2, W // 2
    n_half = B * Ht * Wt

    # TODO(synk): the NCHW<->NHWC transposes and 2x2 patchify below are
    # wrapper-side XLA passes; if the surrounding model can supply/consume NHWC
    # directly they can be removed (the kernel itself only sees flat slabs).
    x_nhwc = jnp.transpose(x, (0, 2, 3, 1))      # (B, H, W, C)
    g_nhwc = jnp.transpose(g, (0, 2, 3, 1))      # (B, Hg, Wg, C)

    # 2x2 patchify in one transpose+reshape: channel block t = 2*a + b of xcat
    # holds x at full-res pixel (2*ht + a, 2*wt + b) — aligned with theta tap
    # (a, b) and with output position t of the patch.
    xcat = (x_nhwc.reshape(B, Ht, 2, Wt, 2, C)
            .transpose(0, 1, 3, 2, 4, 5)         # (B, Ht, Wt, a, b, C)
            .reshape(n_half, 4 * C)).astype(jnp.bfloat16)

    # Nearest upsample of g to (Ht, Wt); the 1x1 phi conv commutes with it, so
    # phi is applied inside the kernel (same indices as F.interpolate 'nearest').
    ih = (jnp.arange(Ht) * Hg) // Ht
    iw = (jnp.arange(Wt) * Wg) // Wt
    gup = g_nhwc[:, ih][:, :, iw].reshape(n_half, C).astype(jnp.bfloat16)

    tm, n_pad = _choose_rows(n_half)
    if n_pad != n_half:
        xcat = jnp.pad(xcat, ((0, n_pad - n_half), (0, 0)))
        gup = jnp.pad(gup, ((0, n_pad - n_half), (0, 0)))

    # Stationary weights, cast once to bf16 for the MXU (f32 accumulation in-kernel).
    tw = params["theta_w"]                       # (O, I, 2, 2)
    wth = jnp.concatenate([tw[:, :, a, b].T for a in (0, 1) for b in (0, 1)],
                          axis=0).astype(jnp.bfloat16)          # (4C, C)
    wphi = params["phi_w"][:, :, 0, 0].T.astype(jnp.bfloat16)
    wpsi = params["psi_w"][:, :, 0, 0].T.astype(jnp.bfloat16)
    ww = params["w_w"][:, :, 0, 0].T.astype(jnp.bfloat16)
    bphi = params["phi_b"].reshape(1, C).astype(jnp.float32)
    bpsi = params["psi_b"].reshape(1, C).astype(jnp.float32)
    bw = params["w_b"].reshape(1, C).astype(jnp.float32)

    out = _fused_gate_pallas(xcat, gup, wth, wphi, bphi, wpsi, bpsi, ww, bw, tm, C)
    out = out[:n_half].astype(jnp.float32)       # drop padded rows, back to f32
    out = (out.reshape(B, Ht, Wt, 2, 2, C)
           .transpose(0, 1, 3, 2, 4, 5)          # (B, Ht, a, Wt, b, C)
           .reshape(B, H, W, C))
    return jnp.transpose(out, (0, 3, 1, 2))      # NCHW


# ------------------------------------------------------------ pure-JAX ref ---

def _conv_nchw(x, w, stride):
    return lax.conv_general_dilated(
        x, w, (stride, stride), "VALID",
        dimension_numbers=("NCHW", "OIHW", "NCHW"))


def attention_gate_ref(x, g, p):
    theta_x = _conv_nchw(x, p["theta_w"], 2)
    phi_g = _conv_nchw(g, p["phi_w"], 1) + p["phi_b"][None, :, None, None]
    Ht, Wt = theta_x.shape[2], theta_x.shape[3]
    Hg, Wg = g.shape[2], g.shape[3]
    ih = (jnp.arange(Ht) * Hg) // Ht
    iw = (jnp.arange(Wt) * Wg) // Wt
    phi_up = phi_g[:, :, ih][:, :, :, iw]
    f = jnp.maximum(theta_x + phi_up, 0.0)
    psi = _conv_nchw(f, p["psi_w"], 1) + p["psi_b"][None, :, None, None]
    s = jax.nn.sigmoid(psi)
    H, W = x.shape[2], x.shape[3]
    jh = (jnp.arange(H) * Ht) // H
    jw = (jnp.arange(W) * Wt) // W
    s_up = s[:, :, jh][:, :, :, jw]
    y = s_up * x
    wy = _conv_nchw(y, p["w_w"], 1) + p["w_b"][None, :, None, None]
    return wy + x


# --------------------------------------------------------------------- main --

if __name__ == "__main__":
    C = 256                       # fixed by the module definition
    B, H, W = 2, 8, 8             # small spatial size for x
    Hg, Wg = 6, 6                 # coarser gating signal g

    key = jax.random.PRNGKey(0)
    ks = jax.random.split(key, 10)

    params = {
        "theta_w": jax.random.normal(ks[0], (C, C, 2, 2), jnp.float32)
                   * (1.0 / jnp.sqrt(4.0 * C)),
        "phi_w": jax.random.normal(ks[1], (C, C, 1, 1), jnp.float32)
                 * (1.0 / jnp.sqrt(1.0 * C)),
        "phi_b": jax.random.normal(ks[2], (C,), jnp.float32) * 0.01,
        "psi_w": jax.random.normal(ks[3], (C, C, 1, 1), jnp.float32)
                 * (1.0 / jnp.sqrt(1.0 * C)),
        "psi_b": jax.random.normal(ks[4], (C,), jnp.float32) * 0.01,
        "w_w": jax.random.normal(ks[5], (C, C, 1, 1), jnp.float32)
               * (1.0 / jnp.sqrt(1.0 * C)),
        "w_b": jax.random.normal(ks[6], (C,), jnp.float32) * 0.01,
    }

    x = jax.random.normal(ks[7], (B, C, H, W), jnp.float32)
    g = jax.random.normal(ks[8], (B, C, Hg, Wg), jnp.float32)

    out = attention_gate(x, g, params)
    out = jax.block_until_ready(out)

    ref = attention_gate_ref(x, g, params)
    assert out.shape == ref.shape == (B, C, H, W)
    err = float(jnp.max(jnp.abs(out - ref)))
    # bf16 matmul operands + bf16 HBM storage of x/streams/output (f32
    # accumulation and elementwise in-kernel) vs. a pure-f32 reference:
    # typical max-abs error ~1e-2..3e-2 at these magnitudes.
    assert err < 1e-1, f"max abs error {err}"

    print("KERNEL_OK")
</pallas_src>

<mosaic_0001>
module attributes {stable_mosaic.version = 11 : i64} {
  func.func @_attention_gate_kernel(%arg0: i32, %arg1: memref<16x1024xbf16, #tpu.memory_space<vmem>>, %arg2: memref<16x256xbf16, #tpu.memory_space<vmem>>, %arg3: memref<1024x256xbf16, #tpu.memory_space<vmem>>, %arg4: memref<256x256xbf16, #tpu.memory_space<vmem>>, %arg5: memref<1x256xf32, #tpu.memory_space<vmem>>, %arg6: memref<256x256xbf16, #tpu.memory_space<vmem>>, %arg7: memref<1x256xf32, #tpu.memory_space<vmem>>, %arg8: memref<256x256xbf16, #tpu.memory_space<vmem>>, %arg9: memref<1x256xf32, #tpu.memory_space<vmem>>, %arg10: memref<16x1024xbf16, #tpu.memory_space<vmem>>) attributes {dimension_semantics = [#tpu.dimension_semantics<parallel>], iteration_bounds = array<i64: 2>, scalar_prefetch = 0 : i64, scratch_operands = 0 : i64, tpu.core_type = #tpu.core_type<tc>, window_params = [{transform_indices = @transform_0, window_bounds = array<i64: 16, 1024>}, {transform_indices = @transform_1, window_bounds = array<i64: 16, 256>}, {pipeline_mode = #tpu.pipeline_mode<synchronous>, transform_indices = @transform_2, window_bounds = array<i64: 1024, 256>}, {pipeline_mode = #tpu.pipeline_mode<synchronous>, transform_indices = @transform_3, window_bounds = array<i64: 256, 256>}, {pipeline_mode = #tpu.pipeline_mode<synchronous>, transform_indices = @transform_4, window_bounds = array<i64: 1, 256>}, {pipeline_mode = #tpu.pipeline_mode<synchronous>, transform_indices = @transform_5, window_bounds = array<i64: 256, 256>}, {pipeline_mode = #tpu.pipeline_mode<synchronous>, transform_indices = @transform_6, window_bounds = array<i64: 1, 256>}, {pipeline_mode = #tpu.pipeline_mode<synchronous>, transform_indices = @transform_7, window_bounds = array<i64: 256, 256>}, {pipeline_mode = #tpu.pipeline_mode<synchronous>, transform_indices = @transform_8, window_bounds = array<i64: 1, 256>}, {transform_indices = @transform_9, window_bounds = array<i64: 16, 1024>}]} {
    %c0 = arith.constant 0 : index
    %c0_0 = arith.constant 0 : index
    %0 = vector.load %arg1[%c0, %c0_0] : memref<16x1024xbf16, #tpu.memory_space<vmem>>, vector<16x1024xbf16>
    %c0_1 = arith.constant 0 : index
    %c0_2 = arith.constant 0 : index
    %1 = vector.load %arg3[%c0_1, %c0_2] : memref<1024x256xbf16, #tpu.memory_space<vmem>>, vector<1024x256xbf16>
    %cst = arith.constant dense<0.000000e+00> : vector<16x256xf32>
    %2 = tpu.matmul %0, %1, %cst {dimension_numbers = #tpu.dot_dimension_numbers<[1], [0], [0], [1], [0, 0, 1, 1], [], []>} : vector<16x1024xbf16>, vector<1024x256xbf16>, vector<16x256xf32> -> vector<16x256xf32>
    %c0_3 = arith.constant 0 : index
    %c0_4 = arith.constant 0 : index
    %3 = vector.load %arg2[%c0_3, %c0_4] : memref<16x256xbf16, #tpu.memory_space<vmem>>, vector<16x256xbf16>
    %c0_5 = arith.constant 0 : index
    %c0_6 = arith.constant 0 : index
    %4 = vector.load %arg4[%c0_5, %c0_6] : memref<256x256xbf16, #tpu.memory_space<vmem>>, vector<256x256xbf16>
    %cst_7 = arith.constant dense<0.000000e+00> : vector<16x256xf32>
    %5 = tpu.matmul %3, %4, %cst_7 {dimension_numbers = #tpu.dot_dimension_numbers<[1], [0], [0], [1], [0, 0, 1, 1], [], []>} : vector<16x256xbf16>, vector<256x256xbf16>, vector<16x256xf32> -> vector<16x256xf32>
    %6 = arith.addf %2, %5 : vector<16x256xf32>
    %c0_8 = arith.constant 0 : index
    %c0_9 = arith.constant 0 : index
    %7 = vector.load %arg5[%c0_8, %c0_9] : memref<1x256xf32, #tpu.memory_space<vmem>>, vector<1x256xf32>
    %8 = vector.broadcast %7 : vector<1x256xf32> to vector<16x256xf32>
    %9 = arith.addf %6, %8 : vector<16x256xf32>
    %cst_10 = arith.constant 0.000000e+00 : f32
    %10 = vector.broadcast %cst_10 : f32 to vector<16x256xf32>
    %11 = arith.maximumf %9, %10 : vector<16x256xf32>
    %12 = arith.truncf %11 : vector<16x256xf32> to vector<16x256xbf16>
    %c0_11 = arith.constant 0 : index
    %c0_12 = arith.constant 0 : index
    %13 = vector.load %arg6[%c0_11, %c0_12] : memref<256x256xbf16, #tpu.memory_space<vmem>>, vector<256x256xbf16>
    %cst_13 = arith.constant dense<0.000000e+00> : vector<16x256xf32>
    %14 = tpu.matmul %12, %13, %cst_13 {dimension_numbers = #tpu.dot_dimension_numbers<[1], [0], [0], [1], [0, 0, 1, 1], [], []>} : vector<16x256xbf16>, vector<256x256xbf16>, vector<16x256xf32> -> vector<16x256xf32>
    %c0_14 = arith.constant 0 : index
    %c0_15 = arith.constant 0 : index
    %15 = vector.load %arg7[%c0_14, %c0_15] : memref<1x256xf32, #tpu.memory_space<vmem>>, vector<1x256xf32>
    %16 = vector.broadcast %15 : vector<1x256xf32> to vector<16x256xf32>
    %17 = arith.addf %14, %16 : vector<16x256xf32>
    %18 = arith.negf %17 : vector<16x256xf32>
    %19 = math.exp %18 : vector<16x256xf32>
    %cst_16 = arith.constant 1.000000e+00 : f32
    %20 = vector.broadcast %cst_16 : f32 to vector<16x256xf32>
    %21 = arith.addf %20, %19 : vector<16x256xf32>
    %22 = arith.divf %20, %21 : vector<16x256xf32>
    %c0_17 = arith.constant 0 : index
    %c0_18 = arith.constant 0 : index
    %23 = vector.load %arg9[%c0_17, %c0_18] : memref<1x256xf32, #tpu.memory_space<vmem>>, vector<1x256xf32>
    %24 = vector.shape_cast %23 : vector<1x256xf32> to vector<1x256xf32>
    %25 = vector.broadcast %24 : vector<1x256xf32> to vector<16x256xf32>
    %c0_19 = arith.constant 0 : index
    %c0_20 = arith.constant 0 : index
    %26 = vector.load %arg1[%c0_19, %c0_20] : memref<16x1024xbf16, #tpu.memory_space<vmem>>, vector<16x256xbf16>
    %27 = arith.extf %26 : vector<16x256xbf16> to vector<16x256xf32>
    %28 = arith.mulf %22, %27 : vector<16x256xf32>
    %29 = arith.truncf %28 : vector<16x256xf32> to vector<16x256xbf16>
    %c0_21 = arith.constant 0 : index
    %c0_22 = arith.constant 0 : index
    %30 = vector.load %arg8[%c0_21, %c0_22] : memref<256x256xbf16, #tpu.memory_space<vmem>>, vector<256x256xbf16>
    %cst_23 = arith.constant dense<0.000000e+00> : vector<16x256xf32>
    %31 = tpu.matmul %29, %30, %cst_23 {dimension_numbers = #tpu.dot_dimension_numbers<[1], [0], [0], [1], [0, 0, 1, 1], [], []>} : vector<16x256xbf16>, vector<256x256xbf16>, vector<16x256xf32> -> vector<16x256xf32>
    %32 = arith.addf %31, %25 : vector<16x256xf32>
    %33 = arith.addf %32, %27 : vector<16x256xf32>
    %34 = arith.truncf %33 : vector<16x256xf32> to vector<16x256xbf16>
    %c0_24 = arith.constant 0 : index
    %c0_25 = arith.constant 0 : index
    %35 = vector.load %arg10[%c0_24, %c0_25] : memref<16x1024xbf16, #tpu.memory_space<vmem>>, vector<16x256xbf16>
    tpu.vector_store %arg10[%c0_24, %c0_25], %34 {strides = array<i32>} : memref<16x1024xbf16, #tpu.memory_space<vmem>>, vector<16x256xbf16>,
    %c0_26 = arith.constant 0 : index
    %c256 = arith.constant 256 : index
    %36 = vector.load %arg1[%c0_26, %c256] : memref<16x1024xbf16, #tpu.memory_space<vmem>>, vector<16x256xbf16>
    %37 = arith.extf %36 : vector<16x256xbf16> to vector<16x256xf32>
    %38 = arith.mulf %22, %37 : vector<16x256xf32>
    %39 = arith.truncf %38 : vector<16x256xf32> to vector<16x256xbf16>
    %c0_27 = arith.constant 0 : index
    %c0_28 = arith.constant 0 : index
    %40 = vector.load %arg8[%c0_27, %c0_28] : memref<256x256xbf16, #tpu.memory_space<vmem>>, vector<256x256xbf16>
    %cst_29 = arith.constant dense<0.000000e+00> : vector<16x256xf32>
    %41 = tpu.matmul %39, %40, %cst_29 {dimension_numbers = #tpu.dot_dimension_numbers<[1], [0], [0], [1], [0, 0, 1, 1], [], []>} : vector<16x256xbf16>, vector<256x256xbf16>, vector<16x256xf32> -> vector<16x256xf32>
    %42 = arith.addf %41, %25 : vector<16x256xf32>
    %43 = arith.addf %42, %37 : vector<16x256xf32>
    %44 = arith.truncf %43 : vector<16x256xf32> to vector<16x256xbf16>
    %c0_30 = arith.constant 0 : index
    %c256_31 = arith.constant 256 : index
    %45 = vector.load %arg10[%c0_30, %c256_31] : memref<16x1024xbf16, #tpu.memory_space<vmem>>, vector<16x256xbf16>
    tpu.vector_store %arg10[%c0_30, %c256_31], %44 {strides = array<i32>} : memref<16x1024xbf16, #tpu.memory_space<vmem>>, vector<16x256xbf16>,
    %c0_32 = arith.constant 0 : index
    %c512 = arith.constant 512 : index
    %46 = vector.load %arg1[%c0_32, %c512] : memref<16x1024xbf16, #tpu.memory_space<vmem>>, vector<16x256xbf16>
    %47 = arith.extf %46 : vector<16x256xbf16> to vector<16x256xf32>
    %48 = arith.mulf %22, %47 : vector<16x256xf32>
    %49 = arith.truncf %48 : vector<16x256xf32> to vector<16x256xbf16>
    %c0_33 = arith.constant 0 : index
    %c0_34 = arith.constant 0 : index
    %50 = vector.load %arg8[%c0_33, %c0_34] : memref<256x256xbf16, #tpu.memory_space<vmem>>, vector<256x256xbf16>
    %cst_35 = arith.constant dense<0.000000e+00> : vector<16x256xf32>
    %51 = tpu.matmul %49, %50, %cst_35 {dimension_numbers = #tpu.dot_dimension_numbers<[1], [0], [0], [1], [0, 0, 1, 1], [], []>} : vector<16x256xbf16>, vector<256x256xbf16>, vector<16x256xf32> -> vector<16x256xf32>
    %52 = arith.addf %51, %25 : vector<16x256xf32>
    %53 = arith.addf %52, %47 : vector<16x256xf32>
    %54 = arith.truncf %53 : vector<16x256xf32> to vector<16x256xbf16>
    %c0_36 = arith.constant 0 : index
    %c512_37 = arith.constant 512 : index
    %55 = vector.load %arg10[%c0_36, %c512_37] : memref<16x1024xbf16, #tpu.memory_space<vmem>>, vector<16x256xbf16>
    tpu.vector_store %arg10[%c0_36, %c512_37], %54 {strides = array<i32>} : memref<16x1024xbf16, #tpu.memory_space<vmem>>, vector<16x256xbf16>,
    %c0_38 = arith.constant 0 : index
    %c768 = arith.constant 768 : index
    %56 = vector.load %arg1[%c0_38, %c768] : memref<16x1024xbf16, #tpu.memory_space<vmem>>, vector<16x256xbf16>
    %57 = arith.extf %56 : vector<16x256xbf16> to vector<16x256xf32>
    %58 = arith.mulf %22, %57 : vector<16x256xf32>
    %59 = arith.truncf %58 : vector<16x256xf32> to vector<16x256xbf16>
    %c0_39 = arith.constant 0 : index
    %c0_40 = arith.constant 0 : index
    %60 = vector.load %arg8[%c0_39, %c0_40] : memref<256x256xbf16, #tpu.memory_space<vmem>>, vector<256x256xbf16>
    %cst_41 = arith.constant dense<0.000000e+00> : vector<16x256xf32>
    %61 = tpu.matmul %59, %60, %cst_41 {dimension_numbers = #tpu.dot_dimension_numbers<[1], [0], [0], [1], [0, 0, 1, 1], [], []>} : vector<16x256xbf16>, vector<256x256xbf16>, vector<16x256xf32> -> vector<16x256xf32>
    %62 = arith.addf %61, %25 : vector<16x256xf32>
    %63 = arith.addf %62, %57 : vector<16x256xf32>
    %64 = arith.truncf %63 : vector<16x256xf32> to vector<16x256xbf16>
    %c0_42 = arith.constant 0 : index
    %c768_43 = arith.constant 768 : index
    %65 = vector.load %arg10[%c0_42, %c768_43] : memref<16x1024xbf16, #tpu.memory_space<vmem>>, vector<16x256xbf16>
    tpu.vector_store %arg10[%c0_42, %c768_43], %64 {strides = array<i32>} : memref<16x1024xbf16, #tpu.memory_space<vmem>>, vector<16x256xbf16>,
    return
  }
  func.func @transform_0(%arg0: i32) -> (i32, i32) {
    %c0_i32 = arith.constant 0 : i32
    %c0_i32_0 = arith.constant 0 : i32
    return %arg0, %c0_i32 : i32, i32
  }
  func.func @transform_1(%arg0: i32) -> (i32, i32) {
    %c0_i32 = arith.constant 0 : i32
    %c0_i32_0 = arith.constant 0 : i32
    return %arg0, %c0_i32 : i32, i32
  }
  func.func @transform_2(%arg0: i32) -> (i32, i32) {
    %c0_i32 = arith.constant 0 : i32
    %c0_i32_0 = arith.constant 0 : i32
    %c0_i32_1 = arith.constant 0 : i32
    return %c0_i32, %c0_i32_0 : i32, i32
  }
  func.func @transform_3(%arg0: i32) -> (i32, i32) {
    %c0_i32 = arith.constant 0 : i32
    %c0_i32_0 = arith.constant 0 : i32
    %c0_i32_1 = arith.constant 0 : i32
    return %c0_i32, %c0_i32_0 : i32, i32
  }
  func.func @transform_4(%arg0: i32) -> (i32, i32) {
    %c0_i32 = arith.constant 0 : i32
    %c0_i32_0 = arith.constant 0 : i32
    %c0_i32_1 = arith.constant 0 : i32
    return %c0_i32, %c0_i32_0 : i32, i32
  }
  func.func @transform_5(%arg0: i32) -> (i32, i32) {
    %c0_i32 = arith.constant 0 : i32
    %c0_i32_0 = arith.constant 0 : i32
    %c0_i32_1 = arith.constant 0 : i32
    return %c0_i32, %c0_i32_0 : i32, i32
  }
  func.func @transform_6(%arg0: i32) -> (i32, i32) {
    %c0_i32 = arith.constant 0 : i32
    %c0_i32_0 = arith.constant 0 : i32
    %c0_i32_1 = arith.constant 0 : i32
    return %c0_i32, %c0_i32_0 : i32, i32
  }
  func.func @transform_7(%arg0: i32) -> (i32, i32) {
    %c0_i32 = arith.constant 0 : i32
    %c0_i32_0 = arith.constant 0 : i32
    %c0_i32_1 = arith.constant 0 : i32
    return %c0_i32, %c0_i32_0 : i32, i32
  }
  func.func @transform_8(%arg0: i32) -> (i32, i32) {
    %c0_i32 = arith.constant 0 : i32
    %c0_i32_0 = arith.constant 0 : i32
    %c0_i32_1 = arith.constant 0 : i32
    return %c0_i32, %c0_i32_0 : i32, i32
  }
  func.func @transform_9(%arg0: i32) -> (i32, i32) {
    %c0_i32 = arith.constant 0 : i32
    %c0_i32_0 = arith.constant 0 : i32
    return %arg0, %c0_i32 : i32, i32
  }
}

</mosaic_0001>

<bundles_post_ra>
// kernel: attention_gate.1
= control target key start
LH: loop header
LB: loop body
LE: loop exit
PB: predicated region body
PF: predicated region fallthrough
CT: control target
= control target key end

     0   :  { %s3842_s30 = smov 0   ;;  %s4922_s0 = inlined_call_operand.vmem [shape: bf16[32,1024], index: 0, kind: input, shape index: {}]   ;;  %s4923_s1 = inlined_call_operand.vmem [shape: bf16[32,256], index: 1, kind: input, shape index: {}]   ;;  %s4924_s2 = inlined_call_operand.vmem [shape: bf16[1024,256], index: 2, kind: input, shape index: {}]   ;;  %s4925_s3 = inlined_call_operand.vmem [shape: bf16[256,256], index: 3, kind: input, shape index: {}]   ;;  %s4926_s4 = inlined_call_operand.vmem [shape: f32[1,256], index: 4, kind: input, shape index: {}]   ;;  %s4927_s5 = inlined_call_operand.vmem [shape: bf16[256,256], index: 5, kind: input, shape index: {}]   ;;  %s4928_s6 = inlined_call_operand.vmem [shape: f32[1,256], index: 6, kind: input, shape index: {}]   ;;  %s4929_s7 = inlined_call_operand.vmem [shape: bf16[256,256], index: 7, kind: input, shape index: {}]   ;;  %s4930_s8 = inlined_call_operand.vmem [shape: f32[1,256], index: 8, kind: input, shape index: {}]   ;;  %s4931_s9 = inlined_call_operand.vmem [shape: bf16[32,1024], index: 9, kind: output, shape index: {}]  }
   0x1 LB: > { %s3036_s10 = sadd.s32 4294967295, %s3790_s30   ;;  %p3040_p0 = scmp.ge.s32.totalorder %s3790_s30, 1  ;;  %s3790_s30 = sphi %s3842_s30, %s19_s30  }
   0x2   : > { %p301_p1 = scmp.lt.s32.totalorder %s3790_s30, 3 }
   0x4   : > { %p302_p2 = pnand %p3040_p0, %p301_p1 }
   0x6   : > { %305 = sbr.rel (%p302_p2) target bundleno = 1220 (0x4c4), region = 56 }
   0xd   : > { %v3429_v0 = vld [vmem:[%s4925_s3 + $0x4] ss:$8 sps:$4 sm:$0xff]   ;;  %v3431_v1 = vld [vmem:[%s4925_s3] ss:$8 sps:$4 sm:$0xff]   ;;  %v3432_v2 = vld [vmem:[%s4925_s3 + $0x14] ss:$8 sps:$4 sm:$0xff]  }
   0xe   : > { %706 = vmatprep.subr.bf16.mxu0 %v3429_v0  ;;  %v3434_v3 = vld [vmem:[%s4925_s3 + $0x10] ss:$8 sps:$4 sm:$0xff]   ;;  %v3435_v4 = vld [vmem:[%s4925_s3 + $0x24] ss:$8 sps:$4 sm:$0xff]   ;;  %s3041_s21 = sshll.u32 %s3036_s10, 1 }
   0xf   : > { %707 = vmatpush1.bf16.msra.mxu0 %v3431_v1  ;;  %v3437_v5 = vld [vmem:[%s4925_s3 + $0x20] ss:$8 sps:$4 sm:$0xff]   ;;  %v3438_v6 = vld [vmem:[%s4925_s3 + $0x34] ss:$8 sps:$4 sm:$0xff]   ;;  %p346_p3 = scmp.lt.s32.totalorder %s3041_s21, 3 }
  0x10   : > { %708 = vmatprep.subr.bf16.mxu0 %v3432_v2  ;;  %v3440_v7 = vld [vmem:[%s4925_s3 + $0x30] ss:$8 sps:$4 sm:$0xff]   ;;  %v3441_v8 = vld [vmem:[%s4925_s3 + $0x44] ss:$8 sps:$4 sm:$0xff]   ;;  %v3443_v9 = vld [vmem:[%s4925_s3 + $0x40] ss:$8 sps:$4 sm:$0xff]  }
  0x11   : > { %s4985_s21 = smov (!%p346_p3, %s3041_s21), 3  ;;  %v3444_v10 = vld [vmem:[%s4925_s3 + $0x54] ss:$8 sps:$4 sm:$0xff]   ;;  %v3446_v11 = vld [vmem:[%s4925_s3 + $0x50] ss:$8 sps:$4 sm:$0xff]  }
  0x12   : > { %s3395_s14 = sshll.u32 %s4985_s21, 3  ;;  %v3447_v12 = vld [vmem:[%s4925_s3 + $0x64] ss:$8 sps:$4 sm:$0xff]   ;;  %v3449_v14 = vld [vmem:[%s4925_s3 + $0x60] ss:$8 sps:$4 sm:$0xff]   ;;  %s3394_s17 = sshll.u32 %s4985_s21, 5 }
  0x13   : > { %709 = vmatpush1.bf16.msra.mxu0 %v3434_v3  ;;  %s3892_s19 = scalar_lea.vmem %s4923_s1, %s3395_s14  ;;  %v3450_v15 = vld [vmem:[%s4925_s3 + $0x74] ss:$8 sps:$4 sm:$0xff]   ;;  %v3452_v16 = vld [vmem:[%s4925_s3 + $0x70] ss:$8 sps:$4 sm:$0xff]   ;;  %v3453_v17 = vld [vmem:[%s4925_s3 + $0x84] ss:$8 sps:$4 sm:$0xff]   ;;  %s3958_s26 = scalar_lea.vmem %s4922_s0, %s3394_s17 }
  0x14   : > { %710 = vmatprep.subr.bf16.mxu0 %v3435_v4  ;;  %v3479_v13 = vld [vmem:[%s3892_s19 + $0x4] ss:$8 sps:$4 sm:$0xff]   ;;  %v3455_v18 = vld [vmem:[%s4925_s3 + $0x80] ss:$8 sps:$4 sm:$0xff]   ;;  %v3456_v19 = vld [vmem:[%s4925_s3 + $0x94] ss:$8 sps:$4 sm:$0xff]   ;;  %s4881_s29 = scalar_lea.vmem %s4931_s9, %s3394_s17 }
  0x15   : > { %738 = vmatprep.mubr.bf16.mxu0 %v3479_v13  ;;  %v3458_v20 = vld [vmem:[%s4925_s3 + $0x90] ss:$8 sps:$4 sm:$0xff]   ;;  %v3459_v21 = vld [vmem:[%s4925_s3 + $0xa4] ss:$8 sps:$4 sm:$0xff]   ;;  %v3461_v22 = vld [vmem:[%s4925_s3 + $0xa0] ss:$8 sps:$4 sm:$0xff]  }
  0x16   : > { %v3462_v23 = vld [vmem:[%s4925_s3 + $0xb4] ss:$8 sps:$4 sm:$0xff]   ;;  %v3464_v24 = vld [vmem:[%s4925_s3 + $0xb0] ss:$8 sps:$4 sm:$0xff]   ;;  %v3465_v25 = vld [vmem:[%s4925_s3 + $0xc4] ss:$8 sps:$4 sm:$0xff]  }
  0x17   : > { %711 = vmatpush1.bf16.msra.mxu0 %v3437_v5  ;;  %v3467_v26 = vld [vmem:[%s4925_s3 + $0xc0] ss:$8 sps:$4 sm:$0xff]   ;;  %v3468_v27 = vld [vmem:[%s4925_s3 + $0xd4] ss:$8 sps:$4 sm:$0xff]   ;;  %v3470_v28 = vld [vmem:[%s4925_s3 + $0xd0] ss:$8 sps:$4 sm:$0xff]  }
  0x18   : > { %712 = vmatprep.subr.bf16.mxu0 %v3438_v6  ;;  %v3471_v29 = vld [vmem:[%s4925_s3 + $0xe4] ss:$8 sps:$4 sm:$0xff]   ;;  %v3473_v30 = vld [vmem:[%s4925_s3 + $0xe0] ss:$8 sps:$4 sm:$0xff]   ;;  %v3474_v31 = vld [vmem:[%s4925_s3 + $0xf4] ss:$8 sps:$4 sm:$0xff]  }
  0x19   : > { %v3476_v32 = vld [vmem:[%s4925_s3 + $0xf0] ss:$8 sps:$4 sm:$0xff]   ;;  %v3482_v33 = vld [vmem:[%s4924_s2 + $0x4] ss:$8 sps:$4 sm:$0xff]   ;;  %v3477_v36 = vld [vmem:[%s3892_s19] ss:$8 sps:$4 sm:$0xff]  }
  0x1a   : > { %v3967_v34 = vld [vmem:[%s3958_s26] sm:$0xff]  ;;  %v3485_v39 = vld [vmem:[%s4924_s2 + $0x14] ss:$8 sps:$4 sm:$0xff]   ;;  %v3483_v40 = vld [vmem:[%s4924_s2 + $0x10] ss:$8 sps:$4 sm:$0xff]  }
  0x1b   : > { %713 = vmatpush1.bf16.msra.mxu0 %v3440_v7  ;;  %v3970_v35 = vld [vmem:[%s3958_s26 + $0x20] sm:$0xff]  ;;  %v3491_v43 = vld [vmem:[%s4924_s2 + $0x34] ss:$8 sps:$4 sm:$0xff]   ;;  %v3489_v44 = vld [vmem:[%s4924_s2 + $0x30] ss:$8 sps:$4 sm:$0xff]  }
  0x1c   : > { %714 = vmatprep.subr.bf16.mxu0 %v3441_v8  ;;  %v3480_v37 = vld [vmem:[%s4924_s2] ss:$8 sps:$4 sm:$0xff]   ;;  %v3085_v38 = vcombine.high %v3967_v34, %v3970_v35  ;;  %v3488_v41 = vld [vmem:[%s4924_s2 + $0x24] ss:$8 sps:$4 sm:$0xff]   ;;  %v3497_v47 = vld [vmem:[%s4924_s2 + $0x54] ss:$8 sps:$4 sm:$0xff]   ;;  %v3084_v8 = vcombine.low %v3967_v34, %v3970_v35 }
  0x1d   : > { %v3486_v42 = vld [vmem:[%s4924_s2 + $0x20] ss:$8 sps:$4 sm:$0xff]   ;;  %v3494_v45 = vld [vmem:[%s4924_s2 + $0x44] ss:$8 sps:$4 sm:$0xff]   ;;  %v3495_v48 = vld [vmem:[%s4924_s2 + $0x50] ss:$8 sps:$4 sm:$0xff]  }
  0x1e   : > { %v3492_v46 = vld [vmem:[%s4924_s2 + $0x40] ss:$8 sps:$4 sm:$0xff]   ;;  %v3500_v49 = vld [vmem:[%s4924_s2 + $0x64] ss:$8 sps:$4 sm:$0xff]   ;;  %v3503_v51 = vld [vmem:[%s4924_s2 + $0x74] ss:$8 sps:$4 sm:$0xff]  }
  0x1f   : > { %715 = vmatpush1.bf16.msra.mxu0 %v3443_v9  ;;  %v3498_v50 = vld [vmem:[%s4924_s2 + $0x60] ss:$8 sps:$4 sm:$0xff]   ;;  %v3501_v52 = vld [vmem:[%s4924_s2 + $0x70] ss:$8 sps:$4 sm:$0xff]   ;;  %v3506_v53 = vld [vmem:[%s4924_s2 + $0x84] ss:$8 sps:$4 sm:$0xff]  }
  0x20   : > { %716 = vmatprep.subr.bf16.mxu0 %v3444_v10  ;;  %v3504_v54 = vld [vmem:[%s4924_s2 + $0x80] ss:$8 sps:$4 sm:$0xff]   ;;  %v3509_v55 = vld [vmem:[%s4924_s2 + $0x94] ss:$8 sps:$4 sm:$0xff]   ;;  %v3507_v56 = vld [vmem:[%s4924_s2 + $0x90] ss:$8 sps:$4 sm:$0xff]  }
  0x21   : > { %v3512_v57 = vld [vmem:[%s4924_s2 + $0xa4] ss:$8 sps:$4 sm:$0xff]   ;;  %v3510_v58 = vld [vmem:[%s4924_s2 + $0xa0] ss:$8 sps:$4 sm:$0xff]   ;;  %v3515_v59 = vld [vmem:[%s4924_s2 + $0xb4] ss:$8 sps:$4 sm:$0xff]  }
  0x22   : > { %v3513_v60 = vld [vmem:[%s4924_s2 + $0xb0] ss:$8 sps:$4 sm:$0xff]   ;;  %v3518_v61 = vld [vmem:[%s4924_s2 + $0xc4] ss:$8 sps:$4 sm:$0xff]   ;;  %v3516_v62 = vld [vmem:[%s4924_s2 + $0xc0] ss:$8 sps:$4 sm:$0xff]  }
  0x23   : > { %717 = vmatpush1.bf16.msra.mxu0 %v3446_v11  ;;  %v3521_v63 = vld [vmem:[%s4924_s2 + $0xd4] ss:$8 sps:$4 sm:$0xff]   ;;  %v3519_v0 = vld [vmem:[%s4924_s2 + $0xd0] ss:$8 sps:$4 sm:$0xff]   ;;  %v3524_v1 = vld [vmem:[%s4924_s2 + $0xe4] ss:$8 sps:$4 sm:$0xff]  }
  0x24   : > { %718 = vmatprep.subr.bf16.mxu0 %v3447_v12  ;;  %v3522_v2 = vld [vmem:[%s4924_s2 + $0xe0] ss:$8 sps:$4 sm:$0xff]   ;;  %v3527_v3 = vld [vmem:[%s4924_s2 + $0xf4] ss:$8 sps:$4 sm:$0xff]   ;;  %v3525_v4 = vld [vmem:[%s4924_s2 + $0xf0] ss:$8 sps:$4 sm:$0xff]  }
  0x25   : > { %v3530_v5 = vld [vmem:[%s4924_s2 + $0x104] ss:$8 sps:$4 sm:$0xff]   ;;  %v3528_v9 = vld [vmem:[%s4924_s2 + $0x100] ss:$8 sps:$4 sm:$0xff]   ;;  %v3533_v11 = vld [vmem:[%s4924_s2 + $0x114] ss:$8 sps:$4 sm:$0xff]  }
  0x26   : > { %v4072_v6 = vld [vmem:[%s3958_s26 + $0x8] sm:$0xff]  ;;  %v3531_v12 = vld [vmem:[%s4924_s2 + $0x110] ss:$8 sps:$4 sm:$0xff]   ;;  %v3569_v35 = vld [vmem:[%s4924_s2 + $0x1d4] ss:$8 sps:$4 sm:$0xff]  }
  0x27   : > { %719 = vmatpush1.bf16.msra.mxu0 %v3449_v14  ;;  %4954 = vst [vmem:[#allocation2_spill] sm:$0xff] %v4072_v6  ;;  %v4075_v7 = vld [vmem:[%s3958_s26 + $0x28] sm:$0xff] }
  0x28   : > { %720 = vmatprep.subr.bf16.mxu0 %v3450_v15  ;;  %v3087_v10 = vcombine.high %v4072_v6, %v4075_v7  ;;  %v3536_v13 = vld [vmem:[%s4924_s2 + $0x124] ss:$8 sps:$4 sm:$0xff]   ;;  %v3534_v14 = vld [vmem:[%s4924_s2 + $0x120] ss:$8 sps:$4 sm:$0xff]   ;;  %v3539_v15 = vld [vmem:[%s4924_s2 + $0x134] ss:$8 sps:$4 sm:$0xff]  }
  0x29   : > { %v3564_v34 = vld [vmem:[%s4924_s2 + $0x1c0] ss:$8 sps:$4 sm:$0xff]  }
  0x2b   : > { %721 = vmatpush1.bf16.msra.mxu0 %v3452_v16  ;;  %v3537_v16 = vld [vmem:[%s4924_s2 + $0x130] ss:$8 sps:$4 sm:$0xff]  }
  0x2c   : > { %722 = vmatprep.subr.bf16.mxu0 %v3453_v17  ;;  %v3542_v17 = vld [vmem:[%s4924_s2 + $0x144] ss:$8 sps:$4 sm:$0xff]  }
  0x2f   : > { %723 = vmatpush1.bf16.msra.mxu0 %v3455_v18  ;;  %v3540_v18 = vld [vmem:[%s4924_s2 + $0x140] ss:$8 sps:$4 sm:$0xff]  }
  0x30   : > { %724 = vmatprep.subr.bf16.mxu0 %v3456_v19  ;;  %v3545_v19 = vld [vmem:[%s4924_s2 + $0x154] ss:$8 sps:$4 sm:$0xff]  }
  0x33   : > { %725 = vmatpush1.bf16.msra.mxu0 %v3458_v20  ;;  %v3543_v20 = vld [vmem:[%s4924_s2 + $0x150] ss:$8 sps:$4 sm:$0xff]  }
  0x34   : > { %726 = vmatprep.subr.bf16.mxu0 %v3459_v21  ;;  %v3548_v21 = vld [vmem:[%s4924_s2 + $0x164] ss:$8 sps:$4 sm:$0xff]  }
  0x37   : > { %727 = vmatpush1.bf16.msra.mxu0 %v3461_v22  ;;  %v3546_v22 = vld [vmem:[%s4924_s2 + $0x160] ss:$8 sps:$4 sm:$0xff]  }
  0x38   : > { %728 = vmatprep.subr.bf16.mxu0 %v3462_v23  ;;  %v3551_v23 = vld [vmem:[%s4924_s2 + $0x174] ss:$8 sps:$4 sm:$0xff]  }
  0x3b   : > { %729 = vmatpush1.bf16.msra.mxu0 %v3464_v24  ;;  %v3549_v24 = vld [vmem:[%s4924_s2 + $0x170] ss:$8 sps:$4 sm:$0xff]  }
  0x3c   : > { %730 = vmatprep.subr.bf16.mxu0 %v3465_v25  ;;  %v3554_v25 = vld [vmem:[%s4924_s2 + $0x184] ss:$8 sps:$4 sm:$0xff]  }
  0x3f   : > { %731 = vmatpush1.bf16.msra.mxu0 %v3467_v26  ;;  %v3552_v26 = vld [vmem:[%s4924_s2 + $0x180] ss:$8 sps:$4 sm:$0xff]  }
  0x40   : > { %732 = vmatprep.subr.bf16.mxu0 %v3468_v27  ;;  %v3557_v27 = vld [vmem:[%s4924_s2 + $0x194] ss:$8 sps:$4 sm:$0xff]  }
  0x43   : > { %733 = vmatpush1.bf16.msra.mxu0 %v3470_v28  ;;  %v3555_v28 = vld [vmem:[%s4924_s2 + $0x190] ss:$8 sps:$4 sm:$0xff]  }
  0x44   : > { %734 = vmatprep.subr.bf16.mxu0 %v3471_v29  ;;  %v3560_v29 = vld [vmem:[%s4924_s2 + $0x1a4] ss:$8 sps:$4 sm:$0xff]  }
  0x47   : > { %735 = vmatpush1.bf16.msra.mxu0 %v3473_v30  ;;  %v3558_v30 = vld [vmem:[%s4924_s2 + $0x1a0] ss:$8 sps:$4 sm:$0xff]  }
  0x48   : > { %736 = vmatprep.subr.bf16.mxu0 %v3474_v31  ;;  %v3563_v31 = vld [vmem:[%s4924_s2 + $0x1b4] ss:$8 sps:$4 sm:$0xff]  }
  0x4b   : > { %737 = vmatpush1.bf16.msra.mxu0 %v3476_v32  ;;  %v3561_v32 = vld [vmem:[%s4924_s2 + $0x1b0] ss:$8 sps:$4 sm:$0xff]  }
  0x4c   : > { %1429 = vmatprep.subr.bf16.mxu0 %v3482_v33  ;;  %v3566_v33 = vld [vmem:[%s4924_s2 + $0x1c4] ss:$8 sps:$4 sm:$0xff]  }
  0x4e   : > { %739 = vmatmul.mubr.bf16.vlgmr.msra.gmra.mrb[0].mxu0 %v3477_v36  ;;  %v3567_v36 = vld [vmem:[%s4924_s2 + $0x1d0] ss:$8 sps:$4 sm:$0xff]  }
  0x4f   : > { %1430 = vmatpush1.bf16.msra.mxu0 %v3480_v37  ;;  %1461 = vmatprep.mubr.bf16.mxu0 %v3085_v38  ;;  %v3572_v37 = vld [vmem:[%s4924_s2 + $0x1e4] ss:$8 sps:$4 sm:$0xff]   ;;  %v3570_v38 = vld [vmem:[%s4924_s2 + $0x1e0] ss:$8 sps:$4 sm:$0xff]  }
  0x50   : > { %1431 = vmatprep.subr.bf16.mxu0 %v3485_v39  ;;  %v3575_v39 = vld [vmem:[%s4924_s2 + $0x1f4] ss:$8 sps:$4 sm:$0xff]  }
  0x53   : > { %1432 = vmatpush1.bf16.msra.mxu0 %v3483_v40  ;;  %v3573_v40 = vld [vmem:[%s4924_s2 + $0x1f0] ss:$8 sps:$4 sm:$0xff]  }
  0x54   : > { %1433 = vmatprep.subr.bf16.mxu0 %v3488_v41  ;;  %v3578_v41 = vld [vmem:[%s4924_s2 + $0x204] ss:$8 sps:$4 sm:$0xff]  }
  0x57   : > { %1434 = vmatpush1.bf16.msra.mxu0 %v3486_v42  ;;  %v4178_v42 = vld [vmem:[%s3958_s26 + $0x10] sm:$0xff] }
  0x58   : > { %1435 = vmatprep.subr.bf16.mxu0 %v3491_v43  ;;  %4955 = vst [vmem:[#allocation3_spill] sm:$0xff] %v4178_v42  ;;  %v4181_v43 = vld [vmem:[%s3958_s26 + $0x30] sm:$0xff] }
  0x5b   : > { %1436 = vmatpush1.bf16.msra.mxu0 %v3489_v44  ;;  %v3086_v44 = vcombine.low %v4072_v6, %v4075_v7 }
  0x5c   : > { %1437 = vmatprep.subr.bf16.mxu0 %v3494_v45  ;;  %v3576_v45 = vld [vmem:[%s4924_s2 + $0x200] ss:$8 sps:$4 sm:$0xff]  }
  0x5f   : > { %1438 = vmatpush1.bf16.msra.mxu0 %v3492_v46  ;;  %v3089_v46 = vcombine.high %v4178_v42, %v4181_v43 }
  0x60   : > { %1439 = vmatprep.subr.bf16.mxu0 %v3497_v47  ;;  %v3581_v47 = vld [vmem:[%s4924_s2 + $0x214] ss:$8 sps:$4 sm:$0xff]  }
  0x63   : > { %1440 = vmatpush1.bf16.msra.mxu0 %v3495_v48  ;;  %v3672_v48 = vld [vmem:[%s4927_s5 + $0x4] ss:$8 sps:$4 sm:$0xff]  }
  0x64   : > { %1441 = vmatprep.subr.bf16.mxu0 %v3500_v49  ;;  %v3674_v49 = vld [vmem:[%s4927_s5] ss:$8 sps:$4 sm:$0xff]   ;;  %1827 = vmatprep.subr.bf16.mxu1 %v3672_v48 }
  0x65   : > { %1828 = vmatpush1.bf16.msra.mxu1 %v3674_v49  ;;  %v3624_v48 = vld [vmem:[%s4924_s2 + $0x300] ss:$8 sps:$4 sm:$0xff]  }
  0x67   : > { %1442 = vmatpush1.bf16.msra.mxu0 %v3498_v50  ;;  %v3675_v50 = vld [vmem:[%s4927_s5 + $0x14] ss:$8 sps:$4 sm:$0xff]  }
  0x68   : > { %1443 = vmatprep.subr.bf16.mxu0 %v3503_v51  ;;  %v3579_v51 = vld [vmem:[%s4924_s2 + $0x210] ss:$8 sps:$4 sm:$0xff]   ;;  %1829 = vmatprep.subr.bf16.mxu1 %v3675_v50  ;;  %v3629_v50 = vld [vmem:[%s4924_s2 + $0x314] ss:$8 sps:$4 sm:$0xff]  }
  0x6b   : > { %1444 = vmatpush1.bf16.msra.mxu0 %v3501_v52  ;;  %v3584_v52 = vld [vmem:[%s4924_s2 + $0x224] ss:$8 sps:$4 sm:$0xff]  }
  0x6c   : > { %1445 = vmatprep.subr.bf16.mxu0 %v3506_v53  ;;  %v3677_v53 = vld [vmem:[%s4927_s5 + $0x10] ss:$8 sps:$4 sm:$0xff]  }
  0x6d   : > { %1830 = vmatpush1.bf16.msra.mxu1 %v3677_v53  ;;  %v3630_v53 = vld [vmem:[%s4924_s2 + $0x320] ss:$8 sps:$4 sm:$0xff]  }
  0x6f   : > { %1446 = vmatpush1.bf16.msra.mxu0 %v3504_v54  ;;  %v3678_v54 = vld [vmem:[%s4927_s5 + $0x24] ss:$8 sps:$4 sm:$0xff]  }
  0x70   : > { %1447 = vmatprep.subr.bf16.mxu0 %v3509_v55  ;;  %v3582_v55 = vld [vmem:[%s4924_s2 + $0x220] ss:$8 sps:$4 sm:$0xff]   ;;  %1831 = vmatprep.subr.bf16.mxu1 %v3678_v54  ;;  %v3635_v54 = vld [vmem:[%s4924_s2 + $0x334] ss:$8 sps:$4 sm:$0xff]  }
  0x73   : > { %1448 = vmatpush1.bf16.msra.mxu0 %v3507_v56  ;;  %v3587_v56 = vld [vmem:[%s4924_s2 + $0x234] ss:$8 sps:$4 sm:$0xff]  }
  0x74   : > { %1449 = vmatprep.subr.bf16.mxu0 %v3512_v57  ;;  %v3680_v57 = vld [vmem:[%s4927_s5 + $0x20] ss:$8 sps:$4 sm:$0xff]  }
  0x75   : > { %1832 = vmatpush1.bf16.msra.mxu1 %v3680_v57  ;;  %v3636_v57 = vld [vmem:[%s4924_s2 + $0x340] ss:$8 sps:$4 sm:$0xff]  }
  0x77   : > { %1450 = vmatpush1.bf16.msra.mxu0 %v3510_v58  ;;  %v3681_v58 = vld [vmem:[%s4927_s5 + $0x34] ss:$8 sps:$4 sm:$0xff]  }
  0x78   : > { %1451 = vmatprep.subr.bf16.mxu0 %v3515_v59  ;;  %v3585_v59 = vld [vmem:[%s4924_s2 + $0x230] ss:$8 sps:$4 sm:$0xff]   ;;  %1833 = vmatprep.subr.bf16.mxu1 %v3681_v58  ;;  %v3641_v58 = vld [vmem:[%s4924_s2 + $0x354] ss:$8 sps:$4 sm:$0xff]  }
  0x7b   : > { %1452 = vmatpush1.bf16.msra.mxu0 %v3513_v60  ;;  %v3590_v60 = vld [vmem:[%s4924_s2 + $0x244] ss:$8 sps:$4 sm:$0xff]  }
  0x7c   : > { %1453 = vmatprep.subr.bf16.mxu0 %v3518_v61  ;;  %v3683_v61 = vld [vmem:[%s4927_s5 + $0x30] ss:$8 sps:$4 sm:$0xff]  }
  0x7d   : > { %1834 = vmatpush1.bf16.msra.mxu1 %v3683_v61  ;;  %v3642_v61 = vld [vmem:[%s4924_s2 + $0x360] ss:$8 sps:$4 sm:$0xff]  }
  0x7f   : > { %1454 = vmatpush1.bf16.msra.mxu0 %v3516_v62  ;;  %v3684_v62 = vld [vmem:[%s4927_s5 + $0x44] ss:$8 sps:$4 sm:$0xff]  }
  0x80   : > { %1455 = vmatprep.subr.bf16.mxu0 %v3521_v63  ;;  %v3588_v63 = vld [vmem:[%s4924_s2 + $0x240] ss:$8 sps:$4 sm:$0xff]   ;;  %1835 = vmatprep.subr.bf16.mxu1 %v3684_v62  ;;  %v3647_v62 = vld [vmem:[%s4924_s2 + $0x374] ss:$8 sps:$4 sm:$0xff]  }
  0x83   : > { %1456 = vmatpush1.bf16.msra.mxu0 %v3519_v0  ;;  %v3593_v0 = vld [vmem:[%s4924_s2 + $0x254] ss:$8 sps:$4 sm:$0xff]  }
  0x84   : > { %1457 = vmatprep.subr.bf16.mxu0 %v3524_v1  ;;  %v3686_v1 = vld [vmem:[%s4927_s5 + $0x40] ss:$8 sps:$4 sm:$0xff]  }
  0x85   : > { %1836 = vmatpush1.bf16.msra.mxu1 %v3686_v1  ;;  %v3648_v1 = vld [vmem:[%s4924_s2 + $0x380] ss:$8 sps:$4 sm:$0xff]  }
  0x87   : > { %1458 = vmatpush1.bf16.msra.mxu0 %v3522_v2  ;;  %v3687_v2 = vld [vmem:[%s4927_s5 + $0x54] ss:$8 sps:$4 sm:$0xff]  }
  0x88   : > { %1459 = vmatprep.subr.bf16.mxu0 %v3527_v3  ;;  %v3591_v3 = vld [vmem:[%s4924_s2 + $0x250] ss:$8 sps:$4 sm:$0xff]   ;;  %1837 = vmatprep.subr.bf16.mxu1 %v3687_v2  ;;  %v3653_v2 = vld [vmem:[%s4924_s2 + $0x394] ss:$8 sps:$4 sm:$0xff]  }
  0x8b   : > { %1460 = vmatpush1.bf16.msra.mxu0 %v3525_v4  ;;  %v3596_v4 = vld [vmem:[%s4924_s2 + $0x264] ss:$8 sps:$4 sm:$0xff]  }
  0x8c   : > { %1472 = vmatprep.subr.bf16.mxu0 %v3530_v5  ;;  %v3689_v5 = vld [vmem:[%s4927_s5 + $0x50] ss:$8 sps:$4 sm:$0xff]  }
  0x8d   : > { %1838 = vmatpush1.bf16.msra.mxu1 %v3689_v5  ;;  %v3654_v5 = vld [vmem:[%s4924_s2 + $0x3a0] ss:$8 sps:$4 sm:$0xff]  }
  0x8e   : > { %1462 = vmatmul.mubr.bf16.vlgmr.msra.gmra.mrb[0].mxu0 %v3084_v8  ;;  %v3690_v8 = vld [vmem:[%s4927_s5 + $0x64] ss:$8 sps:$4 sm:$0xff]  }
  0x8f   : > { %1473 = vmatpush1.bf16.msra.mxu0 %v3528_v9  ;;  %1504 = vmatprep.mubr.bf16.mxu0 %v3087_v10  ;;  %v3594_v9 = vld [vmem:[%s4924_s2 + $0x260] ss:$8 sps:$4 sm:$0xff]   ;;  %v3599_v10 = vld [vmem:[%s4924_s2 + $0x274] ss:$8 sps:$4 sm:$0xff]  }
  0x90   : > { %1474 = vmatprep.subr.bf16.mxu0 %v3533_v11  ;;  %v3692_v11 = vld [vmem:[%s4927_s5 + $0x60] ss:$8 sps:$4 sm:$0xff]   ;;  %1839 = vmatprep.subr.bf16.mxu1 %v3690_v8  ;;  %v3659_v8 = vld [vmem:[%s4924_s2 + $0x3b4] ss:$8 sps:$4 sm:$0xff]  }
  0x91   : > { %1840 = vmatpush1.bf16.msra.mxu1 %v3692_v11  ;;  %v3660_v11 = vld [vmem:[%s4924_s2 + $0x3c0] ss:$8 sps:$4 sm:$0xff]  }
  0x93   : > { %1475 = vmatpush1.bf16.msra.mxu0 %v3531_v12  ;;  %v3693_v12 = vld [vmem:[%s4927_s5 + $0x74] ss:$8 sps:$4 sm:$0xff]  }
  0x94   : > { %1476 = vmatprep.subr.bf16.mxu0 %v3536_v13  ;;  %v3597_v13 = vld [vmem:[%s4924_s2 + $0x270] ss:$8 sps:$4 sm:$0xff]   ;;  %1841 = vmatprep.subr.bf16.mxu1 %v3693_v12  ;;  %v3665_v12 = vld [vmem:[%s4924_s2 + $0x3d4] ss:$8 sps:$4 sm:$0xff]  }
  0x97   : > { %1477 = vmatpush1.bf16.msra.mxu0 %v3534_v14  ;;  %v3602_v14 = vld [vmem:[%s4924_s2 + $0x284] ss:$8 sps:$4 sm:$0xff]  }
  0x98   : > { %1478 = vmatprep.subr.bf16.mxu0 %v3539_v15  ;;  %v3695_v15 = vld [vmem:[%s4927_s5 + $0x70] ss:$8 sps:$4 sm:$0xff]  }
  0x99   : > { %1842 = vmatpush1.bf16.msra.mxu1 %v3695_v15  ;;  %v3666_v15 = vld [vmem:[%s4924_s2 + $0x3e0] ss:$8 sps:$4 sm:$0xff]  }
  0x9b   : > { %1479 = vmatpush1.bf16.msra.mxu0 %v3537_v16  ;;  %v3696_v16 = vld [vmem:[%s4927_s5 + $0x84] ss:$8 sps:$4 sm:$0xff]  }
  0x9c   : > { %1480 = vmatprep.subr.bf16.mxu0 %v3542_v17  ;;  %v3600_v17 = vld [vmem:[%s4924_s2 + $0x280] ss:$8 sps:$4 sm:$0xff]   ;;  %1843 = vmatprep.subr.bf16.mxu1 %v3696_v16  ;;  %v3671_v16 = vld [vmem:[%s4924_s2 + $0x3f4] ss:$8 sps:$4 sm:$0xff]  }
  0x9f   : > { %1481 = vmatpush1.bf16.msra.mxu0 %v3540_v18  ;;  %v3605_v18 = vld [vmem:[%s4924_s2 + $0x294] ss:$8 sps:$4 sm:$0xff]  }
  0xa0   : > { %1482 = vmatprep.subr.bf16.mxu0 %v3545_v19  ;;  %v3698_v19 = vld [vmem:[%s4927_s5 + $0x80] ss:$8 sps:$4 sm:$0xff]  }
  0xa1   : > { %1844 = vmatpush1.bf16.msra.mxu1 %v3698_v19  ;;  %v3713_v19 = vld [vmem:[%s4927_s5 + $0xd0] ss:$8 sps:$4 sm:$0xff]  }
  0xa3   : > { %1483 = vmatpush1.bf16.msra.mxu0 %v3543_v20  ;;  %v3699_v20 = vld [vmem:[%s4927_s5 + $0x94] ss:$8 sps:$4 sm:$0xff]  }
  0xa4   : > { %1484 = vmatprep.subr.bf16.mxu0 %v3548_v21  ;;  %v3603_v21 = vld [vmem:[%s4924_s2 + $0x290] ss:$8 sps:$4 sm:$0xff]   ;;  %1845 = vmatprep.subr.bf16.mxu1 %v3699_v20  ;;  %v3714_v20 = vld [vmem:[%s4927_s5 + $0xe4] ss:$8 sps:$4 sm:$0xff]  }
  0xa7   : > { %1485 = vmatpush1.bf16.msra.mxu0 %v3546_v22  ;;  %v3608_v22 = vld [vmem:[%s4924_s2 + $0x2a4] ss:$8 sps:$4 sm:$0xff]  }
  0xa8   : > { %1486 = vmatprep.subr.bf16.mxu0 %v3551_v23  ;;  %v3701_v23 = vld [vmem:[%s4927_s5 + $0x90] ss:$8 sps:$4 sm:$0xff]  }
  0xa9   : > { %1846 = vmatpush1.bf16.msra.mxu1 %v3701_v23  ;;  %v3719_v23 = vld [vmem:[%s4927_s5 + $0xf0] ss:$8 sps:$4 sm:$0xff]  }
  0xab   : > { %1487 = vmatpush1.bf16.msra.mxu0 %v3549_v24  ;;  %v3702_v24 = vld [vmem:[%s4927_s5 + $0xa4] ss:$8 sps:$4 sm:$0xff]  }
  0xac   : > { %1488 = vmatprep.subr.bf16.mxu0 %v3554_v25  ;;  %v3606_v25 = vld [vmem:[%s4924_s2 + $0x2a0] ss:$8 sps:$4 sm:$0xff]   ;;  %1847 = vmatprep.subr.bf16.mxu1 %v3702_v24  ;;  %v4487_v24 = vld [vmem:[%s4929_s7 + $0x4] ss:$8 sps:$4 sm:$0xff]  }
  0xaf   : > { %1489 = vmatpush1.bf16.msra.mxu0 %v3552_v26  ;;  %v3611_v26 = vld [vmem:[%s4924_s2 + $0x2b4] ss:$8 sps:$4 sm:$0xff]  }
  0xb0   : > { %1490 = vmatprep.subr.bf16.mxu0 %v3557_v27  ;;  %v3704_v27 = vld [vmem:[%s4927_s5 + $0xa0] ss:$8 sps:$4 sm:$0xff]  }
  0xb1   : > { %1848 = vmatpush1.bf16.msra.mxu1 %v3704_v27 }
  0xb3   : > { %1491 = vmatpush1.bf16.msra.mxu0 %v3555_v28  ;;  %v3705_v28 = vld [vmem:[%s4927_s5 + $0xb4] ss:$8 sps:$4 sm:$0xff]  }
  0xb4   : > { %1492 = vmatprep.subr.bf16.mxu0 %v3560_v29  ;;  %v3609_v29 = vld [vmem:[%s4924_s2 + $0x2b0] ss:$8 sps:$4 sm:$0xff]   ;;  %1849 = vmatprep.subr.bf16.mxu1 %v3705_v28  ;;  %v1601_v28 = vld [vmem:[%s4926_s4] sm:$0x3] }
  0xb7   : > { %1493 = vmatpush1.bf16.msra.mxu0 %v3558_v30  ;;  %v3614_v30 = vld [vmem:[%s4924_s2 + $0x2c4] ss:$8 sps:$4 sm:$0xff]  }
  0xb8   : > { %1494 = vmatprep.subr.bf16.mxu0 %v3563_v31  ;;  %v3707_v31 = vld [vmem:[%s4927_s5 + $0xb0] ss:$8 sps:$4 sm:$0xff]  }
  0xb9   : > { %1850 = vmatpush1.bf16.msra.mxu1 %v3707_v31 }
  0xbb   : > { %1495 = vmatpush1.bf16.msra.mxu0 %v3561_v32  ;;  %v3708_v32 = vld [vmem:[%s4927_s5 + $0xc4] ss:$8 sps:$4 sm:$0xff]  }
  0xbc   : > { %1496 = vmatprep.subr.bf16.mxu0 %v3566_v33  ;;  %v3612_v33 = vld [vmem:[%s4924_s2 + $0x2c0] ss:$8 sps:$4 sm:$0xff]   ;;  %1851 = vmatprep.subr.bf16.mxu1 %v3708_v32 }
  0xbf   : > { %1497 = vmatpush1.bf16.msra.mxu0 %v3564_v34  ;;  %v3617_v34 = vld [vmem:[%s4924_s2 + $0x2d4] ss:$8 sps:$4 sm:$0xff]  }
  0xc0   : > { %1498 = vmatprep.subr.bf16.mxu0 %v3569_v35  ;;  %v3710_v35 = vld [vmem:[%s4927_s5 + $0xc0] ss:$8 sps:$4 sm:$0xff]  }
  0xc1   : > { %1852 = vmatpush1.bf16.msra.mxu1 %v3710_v35 }
  0xc3   : > { %1499 = vmatpush1.bf16.msra.mxu0 %v3567_v36  ;;  %v3711_v36 = vld [vmem:[%s4927_s5 + $0xd4] ss:$8 sps:$4 sm:$0xff]  }
  0xc4   : > { %1500 = vmatprep.subr.bf16.mxu0 %v3572_v37  ;;  %v3615_v37 = vld [vmem:[%s4924_s2 + $0x2d0] ss:$8 sps:$4 sm:$0xff]   ;;  %1853 = vmatprep.subr.bf16.mxu1 %v3711_v36 }
  0xc5   : > { %1854 = vmatpush1.bf16.msra.mxu1 %v3713_v19  ;;  %v1655_v19 = vld [vmem:[%s4928_s6] sm:$0x3] }
  0xc6   : > { %1855 = vmatprep.subr.bf16.mxu1 %v3714_v20 }
  0xc7   : > { %1501 = vmatpush1.bf16.msra.mxu0 %v3570_v38  ;;  %v3620_v38 = vld [vmem:[%s4924_s2 + $0x2e4] ss:$8 sps:$4 sm:$0xff]  }
  0xc8   : > { %1502 = vmatprep.subr.bf16.mxu0 %v3575_v39  ;;  %v3618_v39 = vld [vmem:[%s4924_s2 + $0x2e0] ss:$8 sps:$4 sm:$0xff]  }
  0xcb   : > { %1503 = vmatpush1.bf16.msra.mxu0 %v3573_v40  ;;  %v3623_v40 = vld [vmem:[%s4924_s2 + $0x2f4] ss:$8 sps:$4 sm:$0xff]  }
  0xcc   : > { %1515 = vmatprep.subr.bf16.mxu0 %v3578_v41  ;;  %v3621_v41 = vld [vmem:[%s4924_s2 + $0x2f0] ss:$8 sps:$4 sm:$0xff]  }
  0xce   : > { %1505 = vmatmul.mubr.bf16.vlgmr.msra.gmra.mrb[0].mxu0 %v3086_v44  ;;  %v3626_v44 = vld [vmem:[%s4924_s2 + $0x304] ss:$8 sps:$4 sm:$0xff]  }
  0xcf   : > { %1516 = vmatpush1.bf16.msra.mxu0 %v3576_v45  ;;  %1547 = vmatprep.mubr.bf16.mxu0 %v3089_v46  ;;  %v4365_v45 = vld [vmem:[%s3958_s26 + $0x18] sm:$0xff] }
  0xd0   : > { %1517 = vmatprep.subr.bf16.mxu0 %v3581_v47  ;;  %4956 = vst [vmem:[#allocation4_spill] sm:$0xff] %v4365_v45  ;;  %v4368_v46 = vld [vmem:[%s3958_s26 + $0x38] sm:$0xff]  ;;  %v3088_v47 = vcombine.low %v4178_v42, %v4181_v43 }
  0xd1   : > { %v3091_v49 = vcombine.high %v4365_v45, %v4368_v46 }
  0xd3   : > { %1518 = vmatpush1.bf16.msra.mxu0 %v3579_v51  ;;  %v3627_v51 = vld [vmem:[%s4924_s2 + $0x310] ss:$8 sps:$4 sm:$0xff]  }
  0xd4   : > { %1519 = vmatprep.subr.bf16.mxu0 %v3584_v52  ;;  %v3632_v52 = vld [vmem:[%s4924_s2 + $0x324] ss:$8 sps:$4 sm:$0xff]  }
  0xd7   : > { %1520 = vmatpush1.bf16.msra.mxu0 %v3582_v55  ;;  %v3633_v55 = vld [vmem:[%s4924_s2 + $0x330] ss:$8 sps:$4 sm:$0xff]  }
  0xd8   : > { %1521 = vmatprep.subr.bf16.mxu0 %v3587_v56  ;;  %v3638_v56 = vld [vmem:[%s4924_s2 + $0x344] ss:$8 sps:$4 sm:$0xff]  }
  0xdb   : > { %1522 = vmatpush1.bf16.msra.mxu0 %v3585_v59  ;;  %v3639_v59 = vld [vmem:[%s4924_s2 + $0x350] ss:$8 sps:$4 sm:$0xff]  }
  0xdc   : > { %1523 = vmatprep.subr.bf16.mxu0 %v3590_v60  ;;  %v3644_v60 = vld [vmem:[%s4924_s2 + $0x364] ss:$8 sps:$4 sm:$0xff]  }
  0xdf   : > { %1524 = vmatpush1.bf16.msra.mxu0 %v3588_v63  ;;  %v3645_v63 = vld [vmem:[%s4924_s2 + $0x370] ss:$8 sps:$4 sm:$0xff]  }
  0xe0   : > { %1525 = vmatprep.subr.bf16.mxu0 %v3593_v0  ;;  %v3650_v0 = vld [vmem:[%s4924_s2 + $0x384] ss:$8 sps:$4 sm:$0xff]  }
  0xe3   : > { %1526 = vmatpush1.bf16.msra.mxu0 %v3591_v3  ;;  %v3651_v3 = vld [vmem:[%s4924_s2 + $0x390] ss:$8 sps:$4 sm:$0xff]  }
  0xe4   : > { %1527 = vmatprep.subr.bf16.mxu0 %v3596_v4  ;;  %v3656_v4 = vld [vmem:[%s4924_s2 + $0x3a4] ss:$8 sps:$4 sm:$0xff]  }
  0xe7   : > { %1528 = vmatpush1.bf16.msra.mxu0 %v3594_v9  ;;  %v3657_v9 = vld [vmem:[%s4924_s2 + $0x3b0] ss:$8 sps:$4 sm:$0xff]  }
  0xe8   : > { %1529 = vmatprep.subr.bf16.mxu0 %v3599_v10  ;;  %v3662_v10 = vld [vmem:[%s4924_s2 + $0x3c4] ss:$8 sps:$4 sm:$0xff]  }
  0xeb   : > { %1530 = vmatpush1.bf16.msra.mxu0 %v3597_v13  ;;  %v3663_v13 = vld [vmem:[%s4924_s2 + $0x3d0] ss:$8 sps:$4 sm:$0xff]  }
  0xec   : > { %1531 = vmatprep.subr.bf16.mxu0 %v3602_v14  ;;  %v3668_v14 = vld [vmem:[%s4924_s2 + $0x3e4] ss:$8 sps:$4 sm:$0xff]  }
  0xef   : > { %1532 = vmatpush1.bf16.msra.mxu0 %v3600_v17  ;;  %v3669_v17 = vld [vmem:[%s4924_s2 + $0x3f0] ss:$8 sps:$4 sm:$0xff]  }
  0xf0   : > { %1533 = vmatprep.subr.bf16.mxu0 %v3605_v18  ;;  %v3090_v18 = vcombine.low %v4365_v45, %v4368_v46 }
  0xf3   : > { %1534 = vmatpush1.bf16.msra.mxu0 %v3603_v21  ;;  %v3716_v21 = vld [vmem:[%s4927_s5 + $0xe0] ss:$8 sps:$4 sm:$0xff]  }
  0xf4   : > { %1535 = vmatprep.subr.bf16.mxu0 %v3608_v22  ;;  %1856 = vmatpush1.bf16.msra.mxu1 %v3716_v21  ;;  %v3717_v22 = vld [vmem:[%s4927_s5 + $0xf4] ss:$8 sps:$4 sm:$0xff]  }
  0xf5   : > { %1857 = vmatprep.subr.bf16.mxu1 %v3717_v22 }
  0xf7   : > { %1536 = vmatpush1.bf16.msra.mxu0 %v3606_v25  ;;  %v1603_v25 = vlaneseq }
  0xf8   : > { %1537 = vmatprep.subr.bf16.mxu0 %v3611_v26  ;;  %1858 = vmatpush1.bf16.msra.mxu1 %v3719_v23 }
  0xf9   : > { %2110 = vmatprep.subr.bf16.mxu1 %v4487_v24  ;;  %v1604_v26 = vshrl.u32 %v1603_v25, 7 }
  0xfb   : > { %1538 = vmatpush1.bf16.msra.mxu0 %v3609_v29  ;;  %v4490_v27 = vsub.s32 0, %v1604_v26  ;;  %v4495_v29 = vsub.s32 1, %v1604_v26 }
  0xfc   : > { %1539 = vmatprep.subr.bf16.mxu0 %v3614_v30 }
  0xfd   : > { %v1606_v30 = vrot.slane %v1601_v28, %v4490_v27  ;;  %v1610_v31 = vrot.slane %v1601_v28, %v4495_v29  ;;  %v1660_v20 = vrot.slane %v1655_v19, %v4490_v27  ;;  %v1664_v21 = vrot.slane %v1655_v19, %v4495_v29  ;;  %v4695_v19 = vld [vmem:[%s3958_s26 + $0x20] sm:$0xff] }
  0xfe   : > { %4958 = vst [vmem:[#allocation6_spill] sm:$0xff] %v4695_v19 }
  0xff   : > { %1540 = vmatpush1.bf16.msra.mxu0 %v3612_v33 }
 0x100   : > { %1541 = vmatprep.subr.bf16.mxu0 %v3617_v34 }
 0x103   : > { %1542 = vmatpush1.bf16.msra.mxu0 %v3615_v37 }
 0x104   : > { %1543 = vmatprep.subr.bf16.mxu0 %v3620_v38 }
 0x107   : > { %1544 = vmatpush1.bf16.msra.mxu0 %v3618_v39 }
 0x108   : > { %1545 = vmatprep.subr.bf16.mxu0 %v3623_v40 }
 0x10b   : > { %1546 = vmatpush1.bf16.msra.mxu0 %v3621_v41 }
 0x10c   : > { %1558 = vmatprep.subr.bf16.mxu0 %v3626_v44 }
 0x10e   : > { %1548 = vmatmul.mubr.bf16.vlgmr.msra.gmra.mrb[0].mxu0 %v3088_v47 }
 0x10f   : > { %1559 = vmatpush1.bf16.msra.mxu0 %v3624_v48  ;;  %1590 = vmatprep.mubr.bf16.mxu0 %v3091_v49 }
 0x110   : > { %1560 = vmatprep.subr.bf16.mxu0 %v3629_v50  ;;  %v4502_v50 = vld [vmem:[%s4929_s7] ss:$8 sps:$4 sm:$0xff]  }
 0x113   : > { %1561 = vmatpush1.bf16.msra.mxu0 %v3627_v51  ;;  %v4507_v51 = vld [vmem:[%s4929_s7 + $0x14] ss:$8 sps:$4 sm:$0xff]  }
 0x114   : > { %1562 = vmatprep.subr.bf16.mxu0 %v3632_v52  ;;  %v4513_v52 = vld [vmem:[%s4929_s7 + $0x10] ss:$8 sps:$4 sm:$0xff]  }
 0x117   : > { %1563 = vmatpush1.bf16.msra.mxu0 %v3630_v53  ;;  %v4519_v53 = vld [vmem:[%s4929_s7 + $0x24] ss:$8 sps:$4 sm:$0xff]  }
 0x118   : > { %1564 = vmatprep.subr.bf16.mxu0 %v3635_v54  ;;  %v4525_v54 = vld [vmem:[%s4929_s7 + $0x20] ss:$8 sps:$4 sm:$0xff]  }
 0x11b   : > { %1565 = vmatpush1.bf16.msra.mxu0 %v3633_v55  ;;  %v4531_v55 = vld [vmem:[%s4929_s7 + $0x34] ss:$8 sps:$4 sm:$0xff]  }
 0x11c   : > { %1566 = vmatprep.subr.bf16.mxu0 %v3638_v56  ;;  %v4537_v56 = vld [vmem:[%s4929_s7 + $0x30] ss:$8 sps:$4 sm:$0xff]  }
 0x11f   : > { %1567 = vmatpush1.bf16.msra.mxu0 %v3636_v57  ;;  %v4543_v57 = vld [vmem:[%s4929_s7 + $0x44] ss:$8 sps:$4 sm:$0xff]  }
 0x120   : > { %1568 = vmatprep.subr.bf16.mxu0 %v3641_v58  ;;  %v4549_v58 = vld [vmem:[%s4929_s7 + $0x40] ss:$8 sps:$4 sm:$0xff]  }
 0x123   : > { %1569 = vmatpush1.bf16.msra.mxu0 %v3639_v59  ;;  %v4555_v59 = vld [vmem:[%s4929_s7 + $0x54] ss:$8 sps:$4 sm:$0xff]  }
 0x124   : > { %1570 = vmatprep.subr.bf16.mxu0 %v3644_v60  ;;  %v4561_v60 = vld [vmem:[%s4929_s7 + $0x50] ss:$8 sps:$4 sm:$0xff]  }
 0x127   : > { %1571 = vmatpush1.bf16.msra.mxu0 %v3642_v61  ;;  %v4567_v61 = vld [vmem:[%s4929_s7 + $0x64] ss:$8 sps:$4 sm:$0xff]  }
 0x128   : > { %1572 = vmatprep.subr.bf16.mxu0 %v3647_v62  ;;  %v4573_v62 = vld [vmem:[%s4929_s7 + $0x60] ss:$8 sps:$4 sm:$0xff]  }
 0x12b   : > { %1573 = vmatpush1.bf16.msra.mxu0 %v3645_v63  ;;  %v4580_v63 = vld [vmem:[%s4929_s7 + $0x74] ss:$8 sps:$4 sm:$0xff]  }
 0x12c   : > { %1574 = vmatprep.subr.bf16.mxu0 %v3650_v0  ;;  %v4585_v0 = vld [vmem:[%s4929_s7 + $0x70] ss:$8 sps:$4 sm:$0xff]  }
 0x12f   : > { %1575 = vmatpush1.bf16.msra.mxu0 %v3648_v1  ;;  %v4592_v1 = vld [vmem:[%s4929_s7 + $0x84] ss:$8 sps:$4 sm:$0xff]  }
 0x130   : > { %1576 = vmatprep.subr.bf16.mxu0 %v3653_v2  ;;  %v4597_v2 = vld [vmem:[%s4929_s7 + $0x80] ss:$8 sps:$4 sm:$0xff]  }
 0x133   : > { %1577 = vmatpush1.bf16.msra.mxu0 %v3651_v3  ;;  %v4604_v3 = vld [vmem:[%s4929_s7 + $0x94] ss:$8 sps:$4 sm:$0xff]  }
 0x134   : > { %1578 = vmatprep.subr.bf16.mxu0 %v3656_v4  ;;  %v4609_v4 = vld [vmem:[%s4929_s7 + $0x90] ss:$8 sps:$4 sm:$0xff]  }
 0x137   : > { %1579 = vmatpush1.bf16.msra.mxu0 %v3654_v5  ;;  %v4616_v5 = vld [vmem:[%s4929_s7 + $0xa4] ss:$8 sps:$4 sm:$0xff]  }
 0x138   : > { %1580 = vmatprep.subr.bf16.mxu0 %v3659_v8  ;;  %v4621_v8 = vld [vmem:[%s4929_s7 + $0xa0] ss:$8 sps:$4 sm:$0xff]  }
 0x13b   : > { %1581 = vmatpush1.bf16.msra.mxu0 %v3657_v9  ;;  %v4628_v9 = vld [vmem:[%s4929_s7 + $0xb4] ss:$8 sps:$4 sm:$0xff]  }
 0x13c   : > { %1582 = vmatprep.subr.bf16.mxu0 %v3662_v10  ;;  %v4633_v10 = vld [vmem:[%s4929_s7 + $0xb0] ss:$8 sps:$4 sm:$0xff]  }
 0x13f   : > { %1583 = vmatpush1.bf16.msra.mxu0 %v3660_v11  ;;  %v4640_v11 = vld [vmem:[%s4929_s7 + $0xc4] ss:$8 sps:$4 sm:$0xff]  }
 0x140   : > { %1584 = vmatprep.subr.bf16.mxu0 %v3665_v12  ;;  %v4645_v12 = vld [vmem:[%s4929_s7 + $0xc0] ss:$8 sps:$4 sm:$0xff]  }
 0x143   : > { %1585 = vmatpush1.bf16.msra.mxu0 %v3663_v13  ;;  %v4652_v13 = vld [vmem:[%s4929_s7 + $0xd0] ss:$8 sps:$4 sm:$0xff]  }
 0x144   : > { %1586 = vmatprep.subr.bf16.mxu0 %v3668_v14  ;;  %v4657_v14 = vld [vmem:[%s4929_s7 + $0xd4] ss:$8 sps:$4 sm:$0xff]  }
 0x147   : > { %1587 = vmatpush1.bf16.msra.mxu0 %v3666_v15  ;;  %v4662_v15 = vld [vmem:[%s4929_s7 + $0xe4] ss:$8 sps:$4 sm:$0xff]  }
 0x148   : > { %1588 = vmatprep.subr.bf16.mxu0 %v3671_v16  ;;  %v4669_v16 = vld [vmem:[%s4929_s7 + $0xe0] ss:$8 sps:$4 sm:$0xff]  }
 0x14b   : > { %1589 = vmatpush1.bf16.msra.mxu0 %v3669_v17  ;;  %v4675_v17 = vld [vmem:[%s4929_s7 + $0xf4] ss:$8 sps:$4 sm:$0xff]  }
 0x14e   : > { %1591 = vmatmul.mubr.bf16.vlgmr.msra.gmra.mrb[0].mxu0 %v3090_v18  ;;  %v4681_v18 = vld [vmem:[%s4929_s7 + $0xf0] ss:$8 sps:$4 sm:$0xff]  }
 0x221   : > { %v1592_v32 = vpop.f32.mrb[0].mxu0 }
 0x222   : > { %v1613_v33 = vadd.f32 %v1606_v30, %v1592_v32  ;;  %v1594_v34 = vpop.f32.mrb[1].mxu0 }
 0x223   : > { %v1614_v35 = vadd.f32 %v1610_v31, %v1594_v34  ;;  %v1596_v36 = vpop.f32.mrb[2].mxu0 }
 0x224   : > { %v1615_v37 = vadd.f32 %v1606_v30, %v1596_v36  ;;  %v1598_v38 = vpop.f32.mrb[3].mxu0  ;;  %v1617_v40 = vmax.f32 %v1613_v33, 0.0 }
 0x225   : > { %v1616_v39 = vadd.f32 %v1610_v31, %v1598_v38  ;;  %v1618_v44 = vmax.f32 %v1614_v35, 0.0 }
 0x226   : > { %v1619_v41 = vmax.f32 %v1615_v37, 0.0 }
 0x227   : > { %v1620_v47 = vmax.f32 %v1616_v39, 0.0 }
 0x228   : > { %v1621_v48 = vpack.c.bf16 %v1619_v41, %v1617_v40 }
 0x229   : > { %v1622_v49 = vpack.c.bf16 %v1620_v47, %v1618_v44 }
 0x22b   : > { %1859 = vmatprep.mubr.bf16.mxu1 %v1622_v49  ;;  %v4692_v49 = vld [vmem:[%s3958_s26] sm:$0xff] }
 0x22c   : > { %1860 = vmatmul.mubr.bf16.vlgmr.msra.gmra.mrb[0].mxu1 %v1621_v48  ;;  %4957 = vst [vmem:[#allocation5_spill] sm:$0xff] %v4692_v49 }
 0x22d   : > { %2111 = vmatpush1.bf16.msra.mxu1 %v4502_v50 }
 0x22e   : > { %2112 = vmatprep.subr.bf16.mxu1 %v4507_v51 }
 0x231   : > { %2113 = vmatpush1.bf16.msra.mxu1 %v4513_v52 }
 0x232   : > { %2114 = vmatprep.subr.bf16.mxu1 %v4519_v53 }
 0x235   : > { %2115 = vmatpush1.bf16.msra.mxu1 %v4525_v54 }
 0x236   : > { %2116 = vmatprep.subr.bf16.mxu1 %v4531_v55 }
 0x239   : > { %2117 = vmatpush1.bf16.msra.mxu1 %v4537_v56 }
 0x23a   : > { %2118 = vmatprep.subr.bf16.mxu1 %v4543_v57 }
 0x23d   : > { %2119 = vmatpush1.bf16.msra.mxu1 %v4549_v58 }
 0x23e   : > { %2120 = vmatprep.subr.bf16.mxu1 %v4555_v59 }
 0x241   : > { %2121 = vmatpush1.bf16.msra.mxu1 %v4561_v60 }
 0x242   : > { %2122 = vmatprep.subr.bf16.mxu1 %v4567_v61 }
 0x245   : > { %2123 = vmatpush1.bf16.msra.mxu1 %v4573_v62 }
 0x246   : > { %2124 = vmatprep.subr.bf16.mxu1 %v4580_v63 }
 0x249   : > { %2125 = vmatpush1.bf16.msra.mxu1 %v4585_v0 }
 0x24a   : > { %2126 = vmatprep.subr.bf16.mxu1 %v4592_v1 }
 0x24d   : > { %2127 = vmatpush1.bf16.msra.mxu1 %v4597_v2 }
 0x24e   : > { %2128 = vmatprep.subr.bf16.mxu1 %v4604_v3 }
 0x251   : > { %2129 = vmatpush1.bf16.msra.mxu1 %v4609_v4 }
 0x252   : > { %2130 = vmatprep.subr.bf16.mxu1 %v4616_v5 }
 0x255   : > { %2131 = vmatpush1.bf16.msra.mxu1 %v4621_v8 }
 0x256   : > { %2132 = vmatprep.subr.bf16.mxu1 %v4628_v9 }
 0x259   : > { %2133 = vmatpush1.bf16.msra.mxu1 %v4633_v10 }
 0x25a   : > { %2134 = vmatprep.subr.bf16.mxu1 %v4640_v11 }
 0x25d   : > { %2135 = vmatpush1.bf16.msra.mxu1 %v4645_v12 }
 0x25e   : > { %2136 = vmatprep.subr.bf16.mxu1 %v4657_v14 }
 0x261   : > { %2137 = vmatpush1.bf16.msra.mxu1 %v4652_v13 }
 0x262   : > { %2138 = vmatprep.subr.bf16.mxu1 %v4662_v15 }
 0x265   : > { %2139 = vmatpush1.bf16.msra.mxu1 %v4669_v16 }
 0x266   : > { %2140 = vmatprep.subr.bf16.mxu1 %v4675_v17 }
 0x269   : > { %2141 = vmatpush1.bf16.msra.mxu1 %v4681_v18 }
 0x26a   : > { %2375 = vmatprep.subr.bf16.mxu1 %v4487_v24 }
 0x2ff   : > { %v1861_v22 = vpop.f32.mrb[0].mxu1 }
 0x300   : > { %v1862_v23 = vadd.f32 %v1861_v22, %v1660_v20  ;;  %v1863_v25 = vpop.f32.mrb[1].mxu1  ;;  %v4934_v22 = vunpack.c.l.bf16 %v4178_v42 }
 0x301   : > { %v1864_v26 = vadd.f32 %v1863_v25, %v1664_v21  ;;  %v1865_v28 = vpop.f32.mrb[2].mxu1  ;;  %v4938_v25 = vunpack.c.h.bf16 %v4692_v49 }
 0x302   : > { %v3252_v30 = vmul.f32 -1.442695, %v1862_v23  ;;  %v1866_v31 = vadd.f32 %v1865_v28, %v1660_v20  ;;  %v1867_v32 = vpop.f32.mrb[3].mxu1  ;;  %v4932_v20 = vunpack.c.l.bf16 %v4692_v49  ;;  %v4935_v23 = vunpack.c.l.bf16 %v4365_v45 }
 0x303   : > { %v3253_v33 = vmul.f32 -1.442695, %v1864_v26  ;;  %v1868_v34 = vadd.f32 %v1867_v32, %v1664_v21  ;;  %v4933_v21 = vunpack.c.l.bf16 %v4072_v6  ;;  %v4936_v26 = vunpack.c.h.bf16 %v4072_v6 }
 0x304   : > { %3768 = vpow2.f32 %v3252_v30  ;;  %v3254_v35 = vmul.f32 -1.442695, %v1866_v31  ;;  %v4937_v28 = vunpack.c.h.bf16 %v4178_v42  ;;  %v4939_v30 = vunpack.c.h.bf16 %v4365_v45 }
 0x305   : > { %3770 = vpow2.f32 %v3253_v33  ;;  %v3255_v36 = vmul.f32 -1.442695, %v1868_v34  ;;  %v4942_v31 = vunpack.c.l.bf16 %v4695_v19  ;;  %v4945_v32 = vunpack.c.l.bf16 %v4075_v7 }
 0x306   : > { %3772 = vpow2.f32 %v3254_v35  ;;  %v4948_v33 = vunpack.c.l.bf16 %v4181_v43  ;;  %v4951_v34 = vunpack.c.l.bf16 %v4368_v46  ;;  %v4961_v45 = vunpack.c.h.bf16 %v4181_v43 }
 0x307   : > { %3774 = vpow2.f32 %v3255_v36  ;;  %v4962_v42 = vunpack.c.h.bf16 %v4368_v46 }
 0x30e   : > { %v3769_v37 = vpop.eup %3768 }
 0x30f   : > { %v3771_v38 = vpop.eup %3770  ;;  %v1882_v39 = vadd.f32 1.0, %v3769_v37 }
 0x310   : > { %v3773_v40 = vpop.eup %3772  ;;  %v1883_v41 = vadd.f32 1.0, %v3771_v38 }
 0x311   : > { %v3775_v44 = vpop.eup %3774  ;;  %3776 = vrcp.f32 %v1882_v39  ;;  %v1884_v47 = vadd.f32 1.0, %v3773_v40 }
 0x312   : > { %3778 = vrcp.f32 %v1883_v41  ;;  %v1885_v48 = vadd.f32 1.0, %v3775_v44 }
 0x313   : > { %3780 = vrcp.f32 %v1884_v47 }
 0x314   : > { %3782 = vrcp.f32 %v1885_v48 }
 0x31b   : > { %v3777_v35 = vpop.eup %3776 }
 0x31c   : > { %v3779_v40 = vpop.eup %3778  ;;  %v1912_v41 = vmul.f32 %v3777_v35, %v4932_v20  ;;  %v2177_v44 = vmul.f32 %v3777_v35, %v4933_v21  ;;  %v4719_v47 = vmul.f32 %v3777_v35, %v4934_v22  ;;  %v4723_v48 = vmul.f32 %v3777_v35, %v4935_v23 }
 0x31d   : > { %v3781_v37 = vpop.eup %3780  ;;  %v1913_v38 = vmul.f32 %v3779_v40, %v4938_v25  ;;  %v2178_v39 = vmul.f32 %v3779_v40, %v4936_v26  ;;  %v2443_v20 = vmul.f32 %v3779_v40, %v4937_v28  ;;  %v4733_v21 = vmul.f32 %v3779_v40, %v4939_v30 }
 0x31e   : > { %v3783_v22 = vpop.eup %3782  ;;  %v1914_v36 = vmul.f32 %v3781_v37, %v4942_v31  ;;  %v2179_v35 = vmul.f32 %v3781_v37, %v4945_v32  ;;  %v4741_v23 = vmul.f32 %v3781_v37, %v4948_v33  ;;  %v4745_v26 = vmul.f32 %v3781_v37, %v4951_v34 }
 0x31f   : > { %v4959_v28 = vunpack.c.h.bf16 %v4695_v19  ;;  %v4960_v40 = vunpack.c.h.bf16 %v4075_v7  ;;  %v2445_v31 = vmul.f32 %v3783_v22, %v4961_v45  ;;  %v4755_v32 = vmul.f32 %v3783_v22, %v4962_v42 }
 0x320   : > { %v1916_v6 = vpack.c.bf16 %v1914_v36, %v1912_v41  ;;  %v2181_v33 = vpack.c.bf16 %v2179_v35, %v2177_v44  ;;  %v2446_v49 = vpack.c.bf16 %v4741_v23, %v4719_v47  ;;  %v2711_v37 = vpack.c.bf16 %v4745_v26, %v4723_v48 }
 0x321   : > { %v1915_v25 = vmul.f32 %v3783_v22, %v4959_v28  ;;  %v2180_v30 = vmul.f32 %v3783_v22, %v4960_v40  ;;  %v2447_v19 = vpack.c.bf16 %v2445_v31, %v2443_v20  ;;  %v2712_v40 = vpack.c.bf16 %v4755_v32, %v4733_v21  ;;  %v4974_v32 = vld [vmem:[#allocation3_spill] sm:$0xff] }
 0x322   : > { %v4973_v20 = vunpack.c.h.bf16 %v4075_v7  ;;  %v4977_v44 = vunpack.c.l.bf16 %v4181_v43  ;;  %v4978_v35 = vunpack.c.h.bf16 %v4181_v43 }
 0x323   : > { %v1917_v34 = vpack.c.bf16 %v1915_v25, %v1913_v38  ;;  %v2182_v28 = vpack.c.bf16 %v2180_v30, %v2178_v39  ;;  %v4976_v39 = vunpack.c.h.bf16 %v4974_v32 }
 0x325   : > { %2142 = vmatprep.mubr.bf16.mxu1 %v1917_v34 }
 0x326   : > { %2143 = vmatmul.mubr.bf16.vlgmr.msra.gmra.mrb[4].mxu1 %v1916_v6  ;;  %v1894_v6 = vld [vmem:[%s4930_s8] sm:$0x3] }
 0x327   : > { %2376 = vmatpush1.bf16.msra.mxu1 %v4502_v50  ;;  %2407 = vmatprep.mubr.bf16.mxu1 %v2182_v28  ;;  %v1899_v42 = vrot.slane %v1894_v6, %v4490_v27  ;;  %v1903_v45 = vrot.slane %v1894_v6, %v4495_v29  ;;  %v4966_v27 = vld [vmem:[#allocation6_spill] sm:$0xff] }
 0x328   : > { %2377 = vmatprep.subr.bf16.mxu1 %v4507_v51  ;;  %v4967_v29 = vunpack.c.l.bf16 %v4966_v27 }
 0x32b   : > { %2378 = vmatpush1.bf16.msra.mxu1 %v4513_v52 }
 0x32c   : > { %2379 = vmatprep.subr.bf16.mxu1 %v4519_v53 }
 0x32f   : > { %2380 = vmatpush1.bf16.msra.mxu1 %v4525_v54 }
 0x330   : > { %2381 = vmatprep.subr.bf16.mxu1 %v4531_v55 }
 0x333   : > { %2382 = vmatpush1.bf16.msra.mxu1 %v4537_v56 }
 0x334   : > { %2383 = vmatprep.subr.bf16.mxu1 %v4543_v57 }
 0x337   : > { %2384 = vmatpush1.bf16.msra.mxu1 %v4549_v58 }
 0x338   : > { %2385 = vmatprep.subr.bf16.mxu1 %v4555_v59 }
 0x33b   : > { %2386 = vmatpush1.bf16.msra.mxu1 %v4561_v60 }
 0x33c   : > { %2387 = vmatprep.subr.bf16.mxu1 %v4567_v61 }
 0x33f   : > { %2388 = vmatpush1.bf16.msra.mxu1 %v4573_v62 }
 0x340   : > { %2389 = vmatprep.subr.bf16.mxu1 %v4580_v63 }
 0x343   : > { %2390 = vmatpush1.bf16.msra.mxu1 %v4585_v0 }
 0x344   : > { %2391 = vmatprep.subr.bf16.mxu1 %v4592_v1 }
 0x347   : > { %2392 = vmatpush1.bf16.msra.mxu1 %v4597_v2 }
 0x348   : > { %2393 = vmatprep.subr.bf16.mxu1 %v4604_v3 }
 0x34b   : > { %2394 = vmatpush1.bf16.msra.mxu1 %v4609_v4 }
 0x34c   : > { %2395 = vmatprep.subr.bf16.mxu1 %v4616_v5 }
 0x34f   : > { %2396 = vmatpush1.bf16.msra.mxu1 %v4621_v8 }
 0x350   : > { %2397 = vmatprep.subr.bf16.mxu1 %v4628_v9 }
 0x353   : > { %2398 = vmatpush1.bf16.msra.mxu1 %v4633_v10 }
 0x354   : > { %2399 = vmatprep.subr.bf16.mxu1 %v4640_v11 }
 0x357   : > { %2400 = vmatpush1.bf16.msra.mxu1 %v4645_v12 }
 0x358   : > { %2401 = vmatprep.subr.bf16.mxu1 %v4657_v14 }
 0x35b   : > { %2402 = vmatpush1.bf16.msra.mxu1 %v4652_v13 }
 0x35c   : > { %2403 = vmatprep.subr.bf16.mxu1 %v4662_v15 }
 0x35f   : > { %2404 = vmatpush1.bf16.msra.mxu1 %v4669_v16 }
 0x360   : > { %2405 = vmatprep.subr.bf16.mxu1 %v4675_v17 }
 0x363   : > { %2406 = vmatpush1.bf16.msra.mxu1 %v4681_v18 }
 0x364   : > { %2640 = vmatprep.subr.bf16.mxu1 %v4487_v24 }
 0x366   : > { %2408 = vmatmul.mubr.bf16.vlgmr.msra.gmra.mrb[8].mxu1 %v2181_v33  ;;  %v4975_v33 = vunpack.c.l.bf16 %v4974_v32 }
 0x367   : > { %2641 = vmatpush1.bf16.msra.mxu1 %v4502_v50  ;;  %2672 = vmatprep.mubr.bf16.mxu1 %v2447_v19 }
 0x368   : > { %2642 = vmatprep.subr.bf16.mxu1 %v4507_v51 }
 0x36b   : > { %2643 = vmatpush1.bf16.msra.mxu1 %v4513_v52 }
 0x36c   : > { %2644 = vmatprep.subr.bf16.mxu1 %v4519_v53 }
 0x36f   : > { %2645 = vmatpush1.bf16.msra.mxu1 %v4525_v54 }
 0x370   : > { %2646 = vmatprep.subr.bf16.mxu1 %v4531_v55 }
 0x373   : > { %2647 = vmatpush1.bf16.msra.mxu1 %v4537_v56 }
 0x374   : > { %2648 = vmatprep.subr.bf16.mxu1 %v4543_v57 }
 0x377   : > { %2649 = vmatpush1.bf16.msra.mxu1 %v4549_v58 }
 0x378   : > { %2650 = vmatprep.subr.bf16.mxu1 %v4555_v59 }
 0x37b   : > { %2651 = vmatpush1.bf16.msra.mxu1 %v4561_v60 }
 0x37c   : > { %2652 = vmatprep.subr.bf16.mxu1 %v4567_v61 }
 0x37f   : > { %2653 = vmatpush1.bf16.msra.mxu1 %v4573_v62 }
 0x380   : > { %2654 = vmatprep.subr.bf16.mxu1 %v4580_v63 }
 0x383   : > { %2655 = vmatpush1.bf16.msra.mxu1 %v4585_v0 }
 0x384   : > { %2656 = vmatprep.subr.bf16.mxu1 %v4592_v1 }
 0x387   : > { %2657 = vmatpush1.bf16.msra.mxu1 %v4597_v2 }
 0x388   : > { %2658 = vmatprep.subr.bf16.mxu1 %v4604_v3 }
 0x38b   : > { %2659 = vmatpush1.bf16.msra.mxu1 %v4609_v4 }
 0x38c   : > { %2660 = vmatprep.subr.bf16.mxu1 %v4616_v5 }
 0x38f   : > { %2661 = vmatpush1.bf16.msra.mxu1 %v4621_v8 }
 0x390   : > { %2662 = vmatprep.subr.bf16.mxu1 %v4628_v9 }
 0x393   : > { %2663 = vmatpush1.bf16.msra.mxu1 %v4633_v10 }
 0x394   : > { %2664 = vmatprep.subr.bf16.mxu1 %v4640_v11 }
 0x397   : > { %2665 = vmatpush1.bf16.msra.mxu1 %v4645_v12 }
 0x398   : > { %2666 = vmatprep.subr.bf16.mxu1 %v4657_v14 }
 0x39b   : > { %2667 = vmatpush1.bf16.msra.mxu1 %v4652_v13 }
 0x39c   : > { %2668 = vmatprep.subr.bf16.mxu1 %v4662_v15 }
 0x39f   : > { %2669 = vmatpush1.bf16.msra.mxu1 %v4669_v16 }
 0x3a0   : > { %2670 = vmatprep.subr.bf16.mxu1 %v4675_v17 }
 0x3a3   : > { %2671 = vmatpush1.bf16.msra.mxu1 %v4681_v18 }
 0x3a4   : > { %2905 = vmatprep.subr.bf16.mxu1 %v4487_v24 }
 0x3a6   : > { %2673 = vmatmul.mubr.bf16.vlgmr.msra.gmra.mrb[12].mxu1 %v2446_v49 }
 0x3a7   : > { %2906 = vmatpush1.bf16.msra.mxu1 %v4502_v50  ;;  %2937 = vmatprep.mubr.bf16.mxu1 %v2712_v40 }
 0x3a8   : > { %2907 = vmatprep.subr.bf16.mxu1 %v4507_v51 }
 0x3ab   : > { %2908 = vmatpush1.bf16.msra.mxu1 %v4513_v52 }
 0x3ac   : > { %2909 = vmatprep.subr.bf16.mxu1 %v4519_v53 }
 0x3af   : > { %2910 = vmatpush1.bf16.msra.mxu1 %v4525_v54  ;;  %v4963_v54 = vld [vmem:[#allocation5_spill] sm:$0xff] }
 0x3b0   : > { %2911 = vmatprep.subr.bf16.mxu1 %v4531_v55  ;;  %v4964_v55 = vunpack.c.l.bf16 %v4963_v54 }
 0x3b3   : > { %2912 = vmatpush1.bf16.msra.mxu1 %v4537_v56 }
 0x3b4   : > { %2913 = vmatprep.subr.bf16.mxu1 %v4543_v57 }
 0x3b7   : > { %2914 = vmatpush1.bf16.msra.mxu1 %v4549_v58 }
 0x3b8   : > { %2915 = vmatprep.subr.bf16.mxu1 %v4555_v59  ;;  %v4965_v59 = vunpack.c.h.bf16 %v4963_v54 }
 0x3bb   : > { %2916 = vmatpush1.bf16.msra.mxu1 %v4561_v60 }
 0x3bc   : > { %2917 = vmatprep.subr.bf16.mxu1 %v4567_v61 }
 0x3bf   : > { %2918 = vmatpush1.bf16.msra.mxu1 %v4573_v62 }
 0x3c0   : > { %2919 = vmatprep.subr.bf16.mxu1 %v4580_v63 }
 0x3c3   : > { %2920 = vmatpush1.bf16.msra.mxu1 %v4585_v0  ;;  %v4968_v0 = vunpack.c.h.bf16 %v4966_v27  ;;  %v4983_v27 = vunpack.c.h.bf16 %v4368_v46 }
 0x3c4   : > { %2921 = vmatprep.subr.bf16.mxu1 %v4592_v1 }
 0x3c7   : > { %2922 = vmatpush1.bf16.msra.mxu1 %v4597_v2 }
 0x3c8   : > { %2923 = vmatprep.subr.bf16.mxu1 %v4604_v3 }
 0x3cb   : > { %2924 = vmatpush1.bf16.msra.mxu1 %v4609_v4 }
 0x3cc   : > { %2925 = vmatprep.subr.bf16.mxu1 %v4616_v5 }
 0x3cf   : > { %2926 = vmatpush1.bf16.msra.mxu1 %v4621_v8 }
 0x3d0   : > { %2927 = vmatprep.subr.bf16.mxu1 %v4628_v9 }
 0x3d3   : > { %2928 = vmatpush1.bf16.msra.mxu1 %v4633_v10  ;;  %v4969_v10 = vld [vmem:[#allocation2_spill] sm:$0xff] }
 0x3d4   : > { %2929 = vmatprep.subr.bf16.mxu1 %v4640_v11  ;;  %v4970_v11 = vunpack.c.l.bf16 %v4969_v10 }
 0x3d7   : > { %2930 = vmatpush1.bf16.msra.mxu1 %v4645_v12 }
 0x3d8   : > { %2931 = vmatprep.subr.bf16.mxu1 %v4657_v14 }
 0x3db   : > { %2932 = vmatpush1.bf16.msra.mxu1 %v4652_v13 }
 0x3dc   : > { %2933 = vmatprep.subr.bf16.mxu1 %v4662_v15  ;;  %v4971_v15 = vunpack.c.h.bf16 %v4969_v10 }
 0x3df   : > { %2934 = vmatpush1.bf16.msra.mxu1 %v4669_v16 }
 0x3e0   : > { %2935 = vmatprep.subr.bf16.mxu1 %v4675_v17 }
 0x3e3   : > { %2936 = vmatpush1.bf16.msra.mxu1 %v4681_v18  ;;  %v4972_v18 = vunpack.c.l.bf16 %v4075_v7 }
 0x3e6   : > { %2938 = vmatmul.mubr.bf16.vlgmr.msra.gmra.mrb[16].mxu1 %v2711_v37 }
 0x3f9   : > { %v2144_v24 = vpop.f32.mrb[4].mxu1 }
 0x3fa   : > { %v2145_v50 = vadd.f32 %v2144_v24, %v1899_v42  ;;  %v2146_v51 = vpop.f32.mrb[5].mxu1 }
 0x3fb   : > { %v2147_v52 = vadd.f32 %v2146_v51, %v1903_v45  ;;  %v2148_v53 = vpop.f32.mrb[6].mxu1 }
 0x3fc   : > { %v2153_v56 = vadd.f32 %v2145_v50, %v4964_v55  ;;  %v2149_v57 = vadd.f32 %v2148_v53, %v1899_v42  ;;  %v2150_v58 = vpop.f32.mrb[7].mxu1 }
 0x3fd   : > { %v2154_v60 = vadd.f32 %v2147_v52, %v4965_v59  ;;  %v2151_v61 = vadd.f32 %v2150_v58, %v1903_v45  ;;  %v4979_v52 = vld [vmem:[#allocation4_spill] sm:$0xff]  ;;  %v4982_v59 = vunpack.c.l.bf16 %v4368_v46 }
 0x3fe   : > { %v2155_v62 = vadd.f32 %v2149_v57, %v4967_v29  ;;  %v4980_v53 = vunpack.c.l.bf16 %v4979_v52  ;;  %v4981_v57 = vunpack.c.h.bf16 %v4979_v52 }
 0x3ff   : > { %v3397_v63 = vpack.c.bf16 %v2154_v60, %v2153_v56  ;;  %v2156_v1 = vadd.f32 %v2151_v61, %v4968_v0 }
 0x401   : > { %2169 = vst [vmem:[%s4881_s29] sm:$0xff] %v3397_v63  ;;  %v3398_v2 = vpack.c.bf16 %v2156_v1, %v2155_v62 }
 0x403   : > { %2170 = vst [vmem:[%s4881_s29 + $0x20] sm:$0xff] %v3398_v2 }
 0x439   : > { %v2409_v3 = vpop.f32.mrb[8].mxu1 }
 0x43a   : > { %v2410_v4 = vadd.f32 %v2409_v3, %v1899_v42  ;;  %v2411_v5 = vpop.f32.mrb[9].mxu1 }
 0x43b   : > { %v2412_v8 = vadd.f32 %v2411_v5, %v1903_v45  ;;  %v2413_v9 = vpop.f32.mrb[10].mxu1 }
 0x43c   : > { %v2418_v12 = vadd.f32 %v2410_v4, %v4970_v11  ;;  %v2414_v13 = vadd.f32 %v2413_v9, %v1899_v42  ;;  %v2415_v14 = vpop.f32.mrb[11].mxu1 }
 0x43d   : > { %v2419_v16 = vadd.f32 %v2412_v8, %v4971_v15  ;;  %v2416_v17 = vadd.f32 %v2415_v14, %v1903_v45 }
 0x43e   : > { %v2420_v49 = vadd.f32 %v2414_v13, %v4972_v18 }
 0x43f   : > { %v3399_v19 = vpack.c.bf16 %v2419_v16, %v2418_v12  ;;  %v2421_v21 = vadd.f32 %v2416_v17, %v4973_v20 }
 0x441   : > { %2434 = vst [vmem:[%s4881_s29 + $0x8] sm:$0xff] %v3399_v19  ;;  %v3400_v22 = vpack.c.bf16 %v2421_v21, %v2420_v49 }
 0x443   : > { %2435 = vst [vmem:[%s4881_s29 + $0x28] sm:$0xff] %v3400_v22 }
 0x479   : > { %v2674_v23 = vpop.f32.mrb[12].mxu1 }
 0x47a   : > { %v2675_v25 = vadd.f32 %v2674_v23, %v1899_v42  ;;  %v2676_v26 = vpop.f32.mrb[13].mxu1 }
 0x47b   : > { %v2677_v30 = vadd.f32 %v2676_v26, %v1903_v45  ;;  %v2678_v31 = vpop.f32.mrb[14].mxu1 }
 0x47c   : > { %v2683_v34 = vadd.f32 %v2675_v25, %v4975_v33  ;;  %v2679_v36 = vadd.f32 %v2678_v31, %v1899_v42  ;;  %v2680_v38 = vpop.f32.mrb[15].mxu1 }
 0x47d   : > { %v2684_v41 = vadd.f32 %v2677_v30, %v4976_v39  ;;  %v2681_v7 = vadd.f32 %v2680_v38, %v1903_v45 }
 0x47e   : > { %v2685_v47 = vadd.f32 %v2679_v36, %v4977_v44 }
 0x47f   : > { %v3401_v48 = vpack.c.bf16 %v2684_v41, %v2683_v34  ;;  %v2686_v37 = vadd.f32 %v2681_v7, %v4978_v35 }
 0x481   : > { %2699 = vst [vmem:[%s4881_s29 + $0x10] sm:$0xff] %v3401_v48  ;;  %v3402_v28 = vpack.c.bf16 %v2686_v37, %v2685_v47 }
 0x483   : > { %2700 = vst [vmem:[%s4881_s29 + $0x30] sm:$0xff] %v3402_v28 }
 0x4b9   : > { %v2939_v40 = vpop.f32.mrb[16].mxu1 }
 0x4ba   : > { %v2940_v6 = vadd.f32 %v2939_v40, %v1899_v42  ;;  %v2941_v24 = vpop.f32.mrb[17].mxu1 }
 0x4bb   : > { %v2942_v50 = vadd.f32 %v2941_v24, %v1903_v45  ;;  %v2943_v51 = vpop.f32.mrb[18].mxu1 }
 0x4bc   : > { %v2948_v54 = vadd.f32 %v2940_v6, %v4980_v53  ;;  %v2944_v55 = vadd.f32 %v2943_v51, %v1899_v42  ;;  %v2945_v56 = vpop.f32.mrb[19].mxu1 }
 0x4bd   : > { %v2949_v58 = vadd.f32 %v2942_v50, %v4981_v57  ;;  %v2946_v43 = vadd.f32 %v2945_v56, %v1903_v45 }
 0x4be   : > { %v2950_v60 = vadd.f32 %v2944_v55, %v4982_v59 }
 0x4bf   : > { %v3403_v61 = vpack.c.bf16 %v2949_v58, %v2948_v54  ;;  %v2951_v29 = vadd.f32 %v2946_v43, %v4983_v27 }
 0x4c1   : > { %2964 = vst [vmem:[%s4881_s29 + $0x18] sm:$0xff] %v3403_v61  ;;  %v3404_v62 = vpack.c.bf16 %v2951_v29, %v2950_v60 }
 0x4c3   : > { %2965 = vst [vmem:[%s4881_s29 + $0x38] sm:$0xff] %v3404_v62 }
 0x4c4 PF: > { %s19_s30 = sadd.s32 1, %s3790_s30  }
 0x4c5   : > { %p16_p4 = scmp.ge.s32.totalorder %s19_s30, 4  }
 0x4c7   :  { %18 = sbr.rel (!%p16_p4) target bundleno = 1 (0x1), region = 89 }

</bundles_post_ra>
